<compile_context>
chip_gen: v6e
topology: v6e:2x2x1
jax: 0.10.0
libtpu: 0.0.40
codegen_flags: <defaults>
</compile_context>

<pallas_src>
import math
import functools

import numpy as np
import jax
import jax.numpy as jnp
from jax.experimental import pallas as pl
from jax.experimental.pallas import tpu as pltpu


# ----------------------------------------------------------------------------
# In-kernel helpers
# ----------------------------------------------------------------------------
def _layernorm(x, g, b, eps=1e-5):
    mu = jnp.mean(x, axis=-1, keepdims=True)
    var = jnp.mean(jnp.square(x - mu), axis=-1, keepdims=True)
    return (x - mu) * jax.lax.rsqrt(var + eps) * g + b


def _gelu_exact(x):
    # PyTorch nn.GELU() default is the exact erf form (kept exact for parity).
    return 0.5 * x * (1.0 + jax.lax.erf(x * (1.0 / math.sqrt(2.0))))


# ----------------------------------------------------------------------------
# Encoder block kernel (one grid step = one batch element)
# ----------------------------------------------------------------------------
def encoder_block_kernel(x_ref, cosw_ref, sinw_ref,
                         wqkv_ref, wo_ref, bo_ref,
                         w1_ref, b1_ref, w2_ref, b2_ref,
                         ln1g_ref, ln1b_ref, ln2g_ref, ln2b_ref,
                         fing_ref, finb_ref,
                         out_ref,
                         q1_s, q2_s, k1_s, k2_s, v_s, att_s,
                         *, n_heads, d_head, apply_final_ln):
    bf16 = jnp.bfloat16
    x = x_ref[0]                                   # (S, D) f32
    S, D = x.shape
    half = d_head // 2
    dhalf = D // 2
    cosw = cosw_ref[...]                           # (S, D//2) f32, tiled per head
    sinw = sinw_ref[...]

    # ---- attention sub-block -------------------------------------------------
    h1 = _layernorm(x, ln1g_ref[...], ln1b_ref[...])
    qkv = jnp.dot(h1.astype(bf16), wqkv_ref[...],
                  preferred_element_type=jnp.float32)          # (S, 3D) f32

    # wqkv's q/k columns were permuted in the wrapper to a halves-separated
    # layout [all heads' first halves | all heads' second halves], so the
    # half-rotation RoPE of apply_rotary_emb runs on the full width at once.
    # The 1/sqrt(d_head) softmax scale was folded into the q weight columns
    # (one-time, wrapper-side), so no per-step scaling is needed here.
    # Rotated halves go straight into bf16 scratch (full-slab stores, no
    # per-head scatter); the per-head score below contracts the two halves
    # separately so no head-contiguous gather-back is required either.
    q1, q2 = qkv[:, :dhalf], qkv[:, dhalf:D]
    k1, k2 = qkv[:, D:D + dhalf], qkv[:, D + dhalf:2 * D]
    q1_s[...] = (q1 * cosw - q2 * sinw).astype(bf16)
    q2_s[...] = (q2 * cosw + q1 * sinw).astype(bf16)
    k1_s[...] = (k1 * cosw - k2 * sinw).astype(bf16)
    k2_s[...] = (k2 * cosw + k1 * sinw).astype(bf16)
    v_s[...] = qkv[:, 2 * D:].astype(bf16)

    # Additive causal mask, built once and reused for every head.  Scores stay
    # f32, so -1e30 underflows to 0 after the max-subtraction (never meets
    # bf16 arithmetic).
    row = jax.lax.broadcasted_iota(jnp.int32, (S, S), 0)
    col = jax.lax.broadcasted_iota(jnp.int32, (S, S), 1)
    amask = jnp.where(col <= row, 0.0, -1e30).astype(jnp.float32)

    # Per-head loop stays a static Python unroll (static lane slices of the
    # scratch refs bound liveness per iteration); heads-on-grid / flash tiling
    # is the production follow-up (see TODO at top).
    for hd in range(n_heads):
        hs = slice(hd * half, (hd + 1) * half)
        s = jax.lax.dot_general(q1_s[:, hs], k1_s[:, hs],
                                (((1,), (1,)), ((), ())),
                                preferred_element_type=jnp.float32)    # (S, S)
        s = s + jax.lax.dot_general(q2_s[:, hs], k2_s[:, hs],
                                    (((1,), (1,)), ((), ())),
                                    preferred_element_type=jnp.float32)
        s = s + amask
        p = jnp.exp(s - jnp.max(s, axis=-1, keepdims=True))           # unnormalized
        o = jnp.dot(p.astype(bf16), v_s[:, hd * d_head:(hd + 1) * d_head],
                    preferred_element_type=jnp.float32)                # (S, d_head)
        # Normalize after the PV matmul: S*d_head multiplies instead of S*S.
        o = o * pl.reciprocal(jnp.sum(p, axis=-1, keepdims=True), approx=True)
        att_s[:, hd * d_head:(hd + 1) * d_head] = o.astype(bf16)

    att = jnp.dot(att_s[...], wo_ref[...],
                  preferred_element_type=jnp.float32) + bo_ref[...]
    x = x + att

    # ---- feed-forward sub-block ------------------------------------------------
    h2 = _layernorm(x, ln2g_ref[...], ln2b_ref[...])
    f = jnp.dot(h2.astype(bf16), w1_ref[...],
                preferred_element_type=jnp.float32) + b1_ref[...]
    f = _gelu_exact(f)
    f = jnp.dot(f.astype(bf16), w2_ref[...],
                preferred_element_type=jnp.float32) + b2_ref[...]
    y = x + f

    if apply_final_ln:     # static flag: final LayerNorm fused into last layer
        y = _layernorm(y, fing_ref[...], finb_ref[...])
    out_ref[0] = y


# ----------------------------------------------------------------------------
# Wrapper helpers
# ----------------------------------------------------------------------------
def _halves_separated_perm(n_heads, d_head):
    """Column permutation mapping head-contiguous q/k layout to
    [all heads' first halves | all heads' second halves]."""
    half = d_head // 2
    idx = []
    for which in (0, 1):
        for h in range(n_heads):
            for j in range(half):
                idx.append(h * d_head + which * half + j)
    return np.asarray(idx, dtype=np.int32)


@functools.lru_cache(maxsize=None)
def _buffered_one_supported():
    """Probe whether pl.Buffered(1) (single-buffered grid-invariant operands)
    works on this jax/Mosaic build; fall back to default pipelining if not.
    Called eagerly (once) from prepare_params, never inside a traced fn."""
    try:
        def k(a_ref, o_ref):
            o_ref[...] = a_ref[...] + 1.0
        spec = pl.BlockSpec((8, 128), lambda i: (0, 0),
                            pipeline_mode=pl.Buffered(1))
        out = pl.pallas_call(
            k,
            out_shape=jax.ShapeDtypeStruct((16, 128), jnp.float32),
            grid=(2,),
            in_specs=[spec],
            out_specs=pl.BlockSpec((8, 128), lambda i: (i, 0)),
        )(jnp.zeros((8, 128), jnp.float32))
        jax.block_until_ready(out)
        return True
    except Exception:
        return False


def _const_spec(shape, buffered):
    n = len(shape)
    imap = lambda b, _n=n: (0,) * _n
    if buffered:
        return pl.BlockSpec(shape, imap, pipeline_mode=pl.Buffered(1))
    return pl.BlockSpec(shape, imap)


def _vmem_limit_bytes(resident_est):
    """Per-generation scoped-VMEM budget: actual residency with 2x slack,
    capped at ~2/3 of the physical VMEM so v7x (64 MiB) keeps compiler
    headroom while v5e/v6e (128 MiB) can grow."""
    cap = 64 * 2 ** 20
    try:
        info = pltpu.get_tpu_info()
        cap = int(getattr(info, "vmem_capacity_bytes", cap) or cap)
    except Exception:
        pass
    return int(min(max(2 * resident_est, 16 * 2 ** 20), (2 * cap) // 3))


def run_encoder_block(x, cosw, sinw, lp, fin_g, fin_b, n_heads, d_head,
                      apply_final_ln, buffered):
    B, S, D = x.shape
    F = lp["w1"].shape[1]

    kernel = functools.partial(encoder_block_kernel, n_heads=n_heads,
                               d_head=d_head, apply_final_ln=apply_final_ln)

    # Advisory cost estimate for XLA scheduling around the custom call.
    flops = 2 * B * S * D * (3 * D + D + 2 * F) + 4 * B * S * S * D
    transcendentals = B * n_heads * S * S + B * S * F
    weight_bytes = 2 * (3 * D * D + D * D + 2 * D * F)       # bf16 weights
    bytes_accessed = 2 * 4 * B * S * D + weight_bytes + 4 * 2 * S * (D // 2)
    cost = pl.CostEstimate(flops=int(flops),
                           transcendentals=int(transcendentals),
                           bytes_accessed=int(bytes_accessed))

    # Actual residency: weights (single- or double-buffered), double-buffered
    # x/out f32 tiles, bf16 scratch slabs, f32 scores/probs/mask, small params.
    wbuf = 1 if buffered else 2
    resident = (wbuf * weight_bytes
                + 2 * 2 * 4 * S * D
                + 2 * (4 * S * (D // 2) + 2 * S * D)
                + 3 * 4 * S * S
                + 4 * (2 * S * (D // 2) + 6 * D + 2 * F))
    vmem_limit = _vmem_limit_bytes(resident)

    in_specs = [
        pl.BlockSpec((1, S, D), lambda b: (b, 0, 0)),   # x
        _const_spec((S, D // 2), buffered),             # cos (tiled per head)
        _const_spec((S, D // 2), buffered),             # sin (tiled per head)
        _const_spec((D, 3 * D), buffered),              # wqkv (bf16, permuted, q scaled)
        _const_spec((D, D), buffered),                  # wo   (bf16)
        _const_spec((1, D), buffered),                  # bo
        _const_spec((D, F), buffered),                  # w1   (bf16)
        _const_spec((1, F), buffered),                  # b1
        _const_spec((F, D), buffered),                  # w2   (bf16)
        _const_spec((1, D), buffered),                  # b2
        _const_spec((1, D), buffered),                  # ln1 gamma
        _const_spec((1, D), buffered),                  # ln1 beta
        _const_spec((1, D), buffered),                  # ln2 gamma
        _const_spec((1, D), buffered),                  # ln2 beta
        _const_spec((1, D), buffered),                  # final ln gamma
        _const_spec((1, D), buffered),                  # final ln beta
    ]

    return pl.pallas_call(
        kernel,
        out_shape=jax.ShapeDtypeStruct((B, S, D), jnp.float32),
        grid=(B,),
        in_specs=in_specs,
        out_specs=pl.BlockSpec((1, S, D), lambda b: (b, 0, 0)),
        scratch_shapes=[
            pltpu.VMEM((S, D // 2), jnp.bfloat16),   # rotated q, first halves
            pltpu.VMEM((S, D // 2), jnp.bfloat16),   # rotated q, second halves
            pltpu.VMEM((S, D // 2), jnp.bfloat16),   # rotated k, first halves
            pltpu.VMEM((S, D // 2), jnp.bfloat16),   # rotated k, second halves
            pltpu.VMEM((S, D), jnp.bfloat16),        # v (head-contiguous)
            pltpu.VMEM((S, D), jnp.bfloat16),        # per-head attention output slab
        ],
        compiler_params=pltpu.CompilerParams(
            dimension_semantics=("parallel",),
            vmem_limit_bytes=vmem_limit),
        cost_estimate=cost,
    )(x, cosw, sinw, lp["wqkv"], lp["wo"], lp["bo"],
      lp["w1"], lp["b1"], lp["w2"], lp["b2"],
      lp["ln1g"], lp["ln1b"], lp["ln2g"], lp["ln2b"], fin_g, fin_b)


def precompute_freqs(seq_len, n_elem, base=10000):
    # mirrors precompute_freqs_cis (real/imag parts) in float32
    exponents = jnp.arange(0, n_elem, 2)[: n_elem // 2].astype(jnp.float32) / n_elem
    freqs = 1.0 / (base ** exponents)
    t = jnp.arange(seq_len, dtype=jnp.float32)
    angles = jnp.outer(t, freqs)                      # (seq_len, n_elem//2)
    return jnp.cos(angles), jnp.sin(angles)


def prepare_params(params, cfg):
    """One-time, eager weight prep: column-permute wqkv's q/k to the
    halves-separated layout, fold the softmax scale into the q columns,
    cast large weights to bf16, pre-tile cos/sin, probe Buffered(1)."""
    D = cfg["d_model"]
    H = cfg["n_heads"]
    dh = D // H
    half = dh // 2
    scale = 1.0 / math.sqrt(dh)
    bf16 = jnp.bfloat16

    perm = _halves_separated_perm(H, dh)
    # Layout-coupling check: permuted q/k column c must pair with rotary angle
    # index (c % half); cos/sin are tiled per head below with the same rule.
    assert np.array_equal((perm % dh) % half, np.arange(H * dh) % half)
    assert np.array_equal(np.sort(perm), np.arange(H * dh))

    cos_full, sin_full = precompute_freqs(cfg["max_seq_len"], dh)
    prepared = {
        "emb": params["emb"],
        "out_g": params["out_g"],
        "out_b": params["out_b"],
        "cosw": jnp.tile(cos_full, (1, H)),          # (max_seq_len, D//2)
        "sinw": jnp.tile(sin_full, (1, H)),
        "buffered": _buffered_one_supported(),       # eager probe, once
        "layers": [],
    }
    for lp in params["layers"]:
        wq = lp["wqkv"][:, :D][:, perm] * scale      # fold 1/sqrt(d_head) (one-time)
        wk = lp["wqkv"][:, D:2 * D][:, perm]
        wv = lp["wqkv"][:, 2 * D:]
        prepared["layers"].append({
            "wqkv": jnp.concatenate([wq, wk, wv], axis=1).astype(bf16),
            "wo": lp["wo"].astype(bf16),
            "w1": lp["w1"].astype(bf16),
            "w2": lp["w2"].astype(bf16),
            "bo": lp["bo"], "b1": lp["b1"], "b2": lp["b2"],
            "ln1g": lp["ln1g"], "ln1b": lp["ln1b"],
            "ln2g": lp["ln2g"], "ln2b": lp["ln2b"],
        })
    return prepared


def transformer_forward(src, prepared, cfg):
    """src: (B, S) int32 token ids -> (B, S, d_model) float32."""
    d_head = cfg["d_model"] // cfg["n_heads"]
    S = src.shape[1]
    # TODO(synk): embedding gather kept in plain JAX (data-dependent gather).
    x = jnp.take(prepared["emb"], src, axis=0)        # (B, S, D) f32
    cosw = prepared["cosw"][:S]
    sinw = prepared["sinw"][:S]
    layers = prepared["layers"]
    n_layers = len(layers)
    assert n_layers >= 1
    for li, lp in enumerate(layers):
        x = run_encoder_block(x, cosw, sinw, lp,
                              prepared["out_g"], prepared["out_b"],
                              cfg["n_heads"], d_head,
                              apply_final_ln=(li == n_layers - 1),
                              buffered=prepared["buffered"])
    return x


# ----------------------------------------------------------------------------
# Pure-JAX reference (same math and same bf16-at-matmul precision policy)
# ----------------------------------------------------------------------------
def reference_forward(src, params, cfg):
    D = cfg["d_model"]
    H = cfg["n_heads"]
    Dh = D // H
    half = Dh // 2
    scale = 1.0 / math.sqrt(Dh)
    bf16 = jnp.bfloat16
    x = jnp.take(params["emb"], src, axis=0)
    cos_full, sin_full = precompute_freqs(cfg["max_seq_len"], Dh)
    B, S = src.shape
    cos = cos_full[:S][None, :, None, :]
    sin = sin_full[:S][None, :, None, :]

    def rope(t):  # t: (B, S, H, Dh)
        t1, t2 = t[..., :half], t[..., half:]
        return jnp.concatenate([t1 * cos - t2 * sin, t2 * cos + t1 * sin], axis=-1)

    amask = jnp.where(jnp.tril(jnp.ones((S, S), dtype=bool)), 0.0, -1e30)
    for lp in params["layers"]:
        h = _layernorm(x, lp["ln1g"][0], lp["ln1b"][0])
        qkv = jnp.dot(h.astype(bf16), lp["wqkv"].astype(bf16),
                      preferred_element_type=jnp.float32)
        q, k, v = jnp.split(qkv, 3, axis=-1)
        q = rope(q.reshape(B, S, H, Dh)) * scale
        k = rope(k.reshape(B, S, H, Dh))
        v = v.reshape(B, S, H, Dh)
        s = jnp.einsum("bqhd,bkhd->bhqk", q.astype(bf16), k.astype(bf16),
                       preferred_element_type=jnp.float32) + amask
        p = jax.nn.softmax(s, axis=-1)
        att = jnp.einsum("bhqk,bkhd->bqhd", p.astype(bf16), v.astype(bf16),
                         preferred_element_type=jnp.float32).reshape(B, S, D)
        att = jnp.dot(att.astype(bf16), lp["wo"].astype(bf16),
                      preferred_element_type=jnp.float32) + lp["bo"][0]
        x = x + att
        h2 = _layernorm(x, lp["ln2g"][0], lp["ln2b"][0])
        f = jnp.dot(h2.astype(bf16), lp["w1"].astype(bf16),
                    preferred_element_type=jnp.float32) + lp["b1"][0]
        f = _gelu_exact(f)
        f = jnp.dot(f.astype(bf16), lp["w2"].astype(bf16),
                    preferred_element_type=jnp.float32) + lp["b2"][0]
        x = x + f
    return _layernorm(x, params["out_g"][0], params["out_b"][0])


# ----------------------------------------------------------------------------
# Deterministic parameter init (f32 master weights; bf16 prep in prepare_params)
# ----------------------------------------------------------------------------
def init_params(key, cfg):
    D = cfg["d_model"]
    F = cfg["d_model"] * cfg["ff_mult"]
    V = cfg["vocab_size"]
    keys = jax.random.split(key, 1 + cfg["n_layers"])
    params = {
        "emb": jax.random.normal(keys[0], (V, D), jnp.float32) * 0.02,
        "out_g": jnp.ones((1, D), jnp.float32),
        "out_b": jnp.zeros((1, D), jnp.float32),
        "layers": [],
    }
    for li in range(cfg["n_layers"]):
        ks = jax.random.split(keys[1 + li], 8)
        params["layers"].append({
            "wqkv": jax.random.normal(ks[0], (D, 3 * D), jnp.float32) * 0.05,
            "wo":   jax.random.normal(ks[1], (D, D), jnp.float32) * 0.05,
            "bo":   jax.random.normal(ks[2], (1, D), jnp.float32) * 0.01,
            "w1":   jax.random.normal(ks[3], (D, F), jnp.float32) * 0.05,
            "b1":   jax.random.normal(ks[4], (1, F), jnp.float32) * 0.01,
            "w2":   jax.random.normal(ks[5], (F, D), jnp.float32) * 0.05,
            "b2":   jax.random.normal(ks[6], (1, D), jnp.float32) * 0.01,
            "ln1g": jnp.ones((1, D), jnp.float32),
            "ln1b": jnp.zeros((1, D), jnp.float32),
            "ln2g": jnp.ones((1, D), jnp.float32),
            "ln2b": jnp.zeros((1, D), jnp.float32),
        })
    return params


# ----------------------------------------------------------------------------
if __name__ == "__main__":
    cfg = dict(vocab_size=64, d_model=64, n_heads=4, n_layers=2,
               ff_mult=2, drop_p=0.0, max_seq_len=32)
    B, S = 2, 16

    key = jax.random.PRNGKey(0)
    k_param, k_tok = jax.random.split(key)
    params = init_params(k_param, cfg)
    prepared = prepare_params(params, cfg)      # one-time weight prep / probe
    src = jax.random.randint(k_tok, (B, S), 0, cfg["vocab_size"], dtype=jnp.int32)

    out = jax.block_until_ready(transformer_forward(src, prepared, cfg))
    ref = jax.block_until_ready(reference_forward(src, params, cfg))

    assert out.shape == (B, S, cfg["d_model"])
    max_err = float(jnp.max(jnp.abs(out - ref)))
    assert jnp.allclose(out, ref, atol=3e-2, rtol=3e-2), f"max abs err {max_err}"

    print("KERNEL_OK")
</pallas_src>

<mosaic_0001>
module attributes {stable_mosaic.version = 11 : i64} {
  func.func @k(%arg0: i32, %arg1: memref<8x128xf32, #tpu.memory_space<vmem>>, %arg2: memref<8x128xf32, #tpu.memory_space<vmem>>) attributes {dimension_semantics = [#tpu.dimension_semantics<arbitrary>], iteration_bounds = array<i64: 2>, scalar_prefetch = 0 : i64, scratch_operands = 0 : i64, tpu.core_type = #tpu.core_type<tc>, window_params = [{pipeline_mode = #tpu.pipeline_mode<synchronous>, transform_indices = @transform_0, window_bounds = array<i64: 8, 128>}, {transform_indices = @transform_1, window_bounds = array<i64: 8, 128>}]} {
    %c0 = arith.constant 0 : index
    %c0_0 = arith.constant 0 : index
    %0 = vector.load %arg1[%c0, %c0_0] : memref<8x128xf32, #tpu.memory_space<vmem>>, vector<8x128xf32>
    %cst = arith.constant 1.000000e+00 : f32
    %1 = vector.broadcast %cst : f32 to vector<8x128xf32>
    %2 = arith.addf %0, %1 : vector<8x128xf32>
    %c0_1 = arith.constant 0 : index
    %c0_2 = arith.constant 0 : index
    %3 = vector.load %arg2[%c0_1, %c0_2] : memref<8x128xf32, #tpu.memory_space<vmem>>, vector<8x128xf32>
    tpu.vector_store %arg2[%c0_1, %c0_2], %2 {strides = array<i32>} : memref<8x128xf32, #tpu.memory_space<vmem>>, vector<8x128xf32>,
    return
  }
  func.func @transform_0(%arg0: i32) -> (i32, i32) {
    %c0_i32 = arith.constant 0 : i32
    %c0_i32_0 = arith.constant 0 : i32
    %c0_i32_1 = arith.constant 0 : i32
    return %c0_i32, %c0_i32_0 : i32, i32
  }
  func.func @transform_1(%arg0: i32) -> (i32, i32) {
    %c0_i32 = arith.constant 0 : i32
    %c0_i32_0 = arith.constant 0 : i32
    return %arg0, %c0_i32 : i32, i32
  }
}

module attributes {stable_mosaic.version = 11 : i64} {
  func.func @encoder_block_kernel(%arg0: i32, %arg1: memref<1x16x64xf32, #tpu.memory_space<vmem>>, %arg2: memref<16x32xf32, #tpu.memory_space<vmem>>, %arg3: memref<16x32xf32, #tpu.memory_space<vmem>>, %arg4: memref<64x192xbf16, #tpu.memory_space<vmem>>, %arg5: memref<64x64xbf16, #tpu.memory_space<vmem>>, %arg6: memref<1x64xf32, #tpu.memory_space<vmem>>, %arg7: memref<64x128xbf16, #tpu.memory_space<vmem>>, %arg8: memref<1x128xf32, #tpu.memory_space<vmem>>, %arg9: memref<128x64xbf16, #tpu.memory_space<vmem>>, %arg10: memref<1x64xf32, #tpu.memory_space<vmem>>, %arg11: memref<1x64xf32, #tpu.memory_space<vmem>>, %arg12: memref<1x64xf32, #tpu.memory_space<vmem>>, %arg13: memref<1x64xf32, #tpu.memory_space<vmem>>, %arg14: memref<1x64xf32, #tpu.memory_space<vmem>>, %arg15: memref<1x64xf32, #tpu.memory_space<vmem>>, %arg16: memref<1x64xf32, #tpu.memory_space<vmem>>, %arg17: memref<1x16x64xf32, #tpu.memory_space<vmem>>, %arg18: memref<16x32xbf16, #tpu.memory_space<vmem>>, %arg19: memref<16x32xbf16, #tpu.memory_space<vmem>>, %arg20: memref<16x32xbf16, #tpu.memory_space<vmem>>, %arg21: memref<16x32xbf16, #tpu.memory_space<vmem>>, %arg22: memref<16x64xbf16, #tpu.memory_space<vmem>>, %arg23: memref<16x64xbf16, #tpu.memory_space<vmem>>) attributes {dimension_semantics = [#tpu.dimension_semantics<parallel>], iteration_bounds = array<i64: 2>, scalar_prefetch = 0 : i64, scratch_operands = 6 : i64, tpu.core_type = #tpu.core_type<tc>, window_params = [{transform_indices = @transform_0, window_bounds = array<i64: 1, 16, 64>}, {pipeline_mode = #tpu.pipeline_mode<synchronous>, transform_indices = @transform_1, window_bounds = array<i64: 16, 32>}, {pipeline_mode = #tpu.pipeline_mode<synchronous>, transform_indices = @transform_2, window_bounds = array<i64: 16, 32>}, {pipeline_mode = #tpu.pipeline_mode<synchronous>, transform_indices = @transform_3, window_bounds = array<i64: 64, 192>}, {pipeline_mode = #tpu.pipeline_mode<synchronous>, transform_indices = @transform_4, window_bounds = array<i64: 64, 64>}, {pipeline_mode = #tpu.pipeline_mode<synchronous>, transform_indices = @transform_5, window_bounds = array<i64: 1, 64>}, {pipeline_mode = #tpu.pipeline_mode<synchronous>, transform_indices = @transform_6, window_bounds = array<i64: 64, 128>}, {pipeline_mode = #tpu.pipeline_mode<synchronous>, transform_indices = @transform_7, window_bounds = array<i64: 1, 128>}, {pipeline_mode = #tpu.pipeline_mode<synchronous>, transform_indices = @transform_8, window_bounds = array<i64: 128, 64>}, {pipeline_mode = #tpu.pipeline_mode<synchronous>, transform_indices = @transform_9, window_bounds = array<i64: 1, 64>}, {pipeline_mode = #tpu.pipeline_mode<synchronous>, transform_indices = @transform_10, window_bounds = array<i64: 1, 64>}, {pipeline_mode = #tpu.pipeline_mode<synchronous>, transform_indices = @transform_11, window_bounds = array<i64: 1, 64>}, {pipeline_mode = #tpu.pipeline_mode<synchronous>, transform_indices = @transform_12, window_bounds = array<i64: 1, 64>}, {pipeline_mode = #tpu.pipeline_mode<synchronous>, transform_indices = @transform_13, window_bounds = array<i64: 1, 64>}, {pipeline_mode = #tpu.pipeline_mode<synchronous>, transform_indices = @transform_14, window_bounds = array<i64: 1, 64>}, {pipeline_mode = #tpu.pipeline_mode<synchronous>, transform_indices = @transform_15, window_bounds = array<i64: 1, 64>}, {transform_indices = @transform_16, window_bounds = array<i64: 1, 16, 64>}]} {
    %c0 = arith.constant 0 : index
    %c0_0 = arith.constant 0 : index
    %c0_1 = arith.constant 0 : index
    %0 = vector.load %arg1[%c0, %c0_0, %c0_1] : memref<1x16x64xf32, #tpu.memory_space<vmem>>, vector<1x16x64xf32>
    %1 = vector.shape_cast %0 : vector<1x16x64xf32> to vector<16x64xf32>
    %c0_2 = arith.constant 0 : index
    %c0_3 = arith.constant 0 : index
    %2 = vector.load %arg2[%c0_2, %c0_3] : memref<16x32xf32, #tpu.memory_space<vmem>>, vector<16x32xf32>
    %c0_4 = arith.constant 0 : index
    %c0_5 = arith.constant 0 : index
    %3 = vector.load %arg3[%c0_4, %c0_5] : memref<16x32xf32, #tpu.memory_space<vmem>>, vector<16x32xf32>
    %c0_6 = arith.constant 0 : index
    %c0_7 = arith.constant 0 : index
    %4 = vector.load %arg11[%c0_6, %c0_7] : memref<1x64xf32, #tpu.memory_space<vmem>>, vector<1x64xf32>
    %c0_8 = arith.constant 0 : index
    %c0_9 = arith.constant 0 : index
    %5 = vector.load %arg12[%c0_8, %c0_9] : memref<1x64xf32, #tpu.memory_space<vmem>>, vector<1x64xf32>
    %cst = arith.constant dense<0.000000e+00> : vector<16xf32>
    %6 = vector.multi_reduction <add>, %1, %cst [1] : vector<16x64xf32> to vector<16xf32>
    %7 = vector.shape_cast %6 : vector<16xf32> to vector<16x1xf32>
    %cst_10 = arith.constant 6.400000e+01 : f32
    %8 = vector.broadcast %cst_10 : f32 to vector<16x1xf32>
    %9 = arith.divf %7, %8 : vector<16x1xf32>
    %10 = vector.broadcast %9 : vector<16x1xf32> to vector<16x64xf32>
    %11 = arith.subf %1, %10 : vector<16x64xf32>
    %12 = arith.mulf %11, %11 : vector<16x64xf32>
    %cst_11 = arith.constant dense<0.000000e+00> : vector<16xf32>
    %13 = vector.multi_reduction <add>, %12, %cst_11 [1] : vector<16x64xf32> to vector<16xf32>
    %14 = vector.shape_cast %13 : vector<16xf32> to vector<16x1xf32>
    %cst_12 = arith.constant 6.400000e+01 : f32
    %15 = vector.broadcast %cst_12 : f32 to vector<16x1xf32>
    %16 = arith.divf %14, %15 : vector<16x1xf32>
    %17 = vector.broadcast %9 : vector<16x1xf32> to vector<16x64xf32>
    %18 = arith.subf %1, %17 : vector<16x64xf32>
    %cst_13 = arith.constant 9.99999974E-6 : f32
    %19 = vector.broadcast %cst_13 : f32 to vector<16x1xf32>
    %20 = arith.addf %16, %19 : vector<16x1xf32>
    %21 = math.rsqrt %20 : vector<16x1xf32>
    %22 = vector.broadcast %21 : vector<16x1xf32> to vector<16x64xf32>
    %23 = arith.mulf %18, %22 : vector<16x64xf32>
    %24 = vector.broadcast %4 : vector<1x64xf32> to vector<16x64xf32>
    %25 = arith.mulf %23, %24 : vector<16x64xf32>
    %26 = vector.broadcast %5 : vector<1x64xf32> to vector<16x64xf32>
    %27 = arith.addf %25, %26 : vector<16x64xf32>
    %28 = arith.truncf %27 : vector<16x64xf32> to vector<16x64xbf16>
    %c0_14 = arith.constant 0 : index
    %c0_15 = arith.constant 0 : index
    %29 = vector.load %arg4[%c0_14, %c0_15] : memref<64x192xbf16, #tpu.memory_space<vmem>>, vector<64x192xbf16>
    %cst_16 = arith.constant dense<0.000000e+00> : vector<16x192xf32>
    %30 = tpu.matmul %28, %29, %cst_16 {dimension_numbers = #tpu.dot_dimension_numbers<[1], [0], [0], [1], [0, 0, 1, 1], [], []>} : vector<16x64xbf16>, vector<64x192xbf16>, vector<16x192xf32> -> vector<16x192xf32>
    %31 = vector.extract_strided_slice %30 {offsets = [0, 0], sizes = [16, 32], strides = [1, 1]} : vector<16x192xf32> to vector<16x32xf32>
    %32 = vector.extract_strided_slice %30 {offsets = [0, 32], sizes = [16, 32], strides = [1, 1]} : vector<16x192xf32> to vector<16x32xf32>
    %33 = vector.extract_strided_slice %30 {offsets = [0, 64], sizes = [16, 32], strides = [1, 1]} : vector<16x192xf32> to vector<16x32xf32>
    %34 = vector.extract_strided_slice %30 {offsets = [0, 96], sizes = [16, 32], strides = [1, 1]} : vector<16x192xf32> to vector<16x32xf32>
    %35 = arith.mulf %31, %2 : vector<16x32xf32>
    %36 = arith.mulf %32, %3 : vector<16x32xf32>
    %37 = arith.subf %35, %36 : vector<16x32xf32>
    %38 = arith.truncf %37 : vector<16x32xf32> to vector<16x32xbf16>
    %c0_17 = arith.constant 0 : index
    %c0_18 = arith.constant 0 : index
    %39 = vector.load %arg18[%c0_17, %c0_18] : memref<16x32xbf16, #tpu.memory_space<vmem>>, vector<16x32xbf16>
    tpu.vector_store %arg18[%c0_17, %c0_18], %38 {strides = array<i32>} : memref<16x32xbf16, #tpu.memory_space<vmem>>, vector<16x32xbf16>,
    %40 = arith.mulf %32, %2 : vector<16x32xf32>
    %41 = arith.mulf %31, %3 : vector<16x32xf32>
    %42 = arith.addf %40, %41 : vector<16x32xf32>
    %43 = arith.truncf %42 : vector<16x32xf32> to vector<16x32xbf16>
    %c0_19 = arith.constant 0 : index
    %c0_20 = arith.constant 0 : index
    %44 = vector.load %arg19[%c0_19, %c0_20] : memref<16x32xbf16, #tpu.memory_space<vmem>>, vector<16x32xbf16>
    tpu.vector_store %arg19[%c0_19, %c0_20], %43 {strides = array<i32>} : memref<16x32xbf16, #tpu.memory_space<vmem>>, vector<16x32xbf16>,
    %45 = arith.mulf %33, %2 : vector<16x32xf32>
    %46 = arith.mulf %34, %3 : vector<16x32xf32>
    %47 = arith.subf %45, %46 : vector<16x32xf32>
    %48 = arith.truncf %47 : vector<16x32xf32> to vector<16x32xbf16>
    %c0_21 = arith.constant 0 : index
    %c0_22 = arith.constant 0 : index
    %49 = vector.load %arg20[%c0_21, %c0_22] : memref<16x32xbf16, #tpu.memory_space<vmem>>, vector<16x32xbf16>
    tpu.vector_store %arg20[%c0_21, %c0_22], %48 {strides = array<i32>} : memref<16x32xbf16, #tpu.memory_space<vmem>>, vector<16x32xbf16>,
    %50 = arith.mulf %34, %2 : vector<16x32xf32>
    %51 = arith.mulf %33, %3 : vector<16x32xf32>
    %52 = arith.addf %50, %51 : vector<16x32xf32>
    %53 = arith.truncf %52 : vector<16x32xf32> to vector<16x32xbf16>
    %c0_23 = arith.constant 0 : index
    %c0_24 = arith.constant 0 : index
    %54 = vector.load %arg21[%c0_23, %c0_24] : memref<16x32xbf16, #tpu.memory_space<vmem>>, vector<16x32xbf16>
    tpu.vector_store %arg21[%c0_23, %c0_24], %53 {strides = array<i32>} : memref<16x32xbf16, #tpu.memory_space<vmem>>, vector<16x32xbf16>,
    %55 = vector.extract_strided_slice %30 {offsets = [0, 128], sizes = [16, 64], strides = [1, 1]} : vector<16x192xf32> to vector<16x64xf32>
    %56 = arith.truncf %55 : vector<16x64xf32> to vector<16x64xbf16>
    %c0_25 = arith.constant 0 : index
    %c0_26 = arith.constant 0 : index
    %57 = vector.load %arg22[%c0_25, %c0_26] : memref<16x64xbf16, #tpu.memory_space<vmem>>, vector<16x64xbf16>
    tpu.vector_store %arg22[%c0_25, %c0_26], %56 {strides = array<i32>} : memref<16x64xbf16, #tpu.memory_space<vmem>>, vector<16x64xbf16>,
    %58 = tpu.iota {dimensions = array<i32: 0>} : vector<16x16xi32>
    %59 = tpu.iota {dimensions = array<i32: 1>} : vector<16x16xi32>
    %60 = arith.cmpi sle, %59, %58 : vector<16x16xi32>
    %cst_27 = arith.constant 0.000000e+00 : f32
    %cst_28 = arith.constant -1.000000e+30 : f32
    %61 = vector.broadcast %cst_27 : f32 to vector<16x16xf32>
    %62 = vector.broadcast %cst_28 : f32 to vector<16x16xf32>
    %63 = arith.select %60, %61, %62 : vector<16x16xi1>, vector<16x16xf32>
    %c0_29 = arith.constant 0 : index
    %c0_30 = arith.constant 0 : index
    %64 = vector.load %arg18[%c0_29, %c0_30] : memref<16x32xbf16, #tpu.memory_space<vmem>>, vector<16x8xbf16>
    %c0_31 = arith.constant 0 : index
    %c0_32 = arith.constant 0 : index
    %65 = vector.load %arg20[%c0_31, %c0_32] : memref<16x32xbf16, #tpu.memory_space<vmem>>, vector<16x8xbf16>
    %cst_33 = arith.constant dense<0.000000e+00> : vector<16x16xf32>
    %66 = tpu.matmul %64, %65, %cst_33 {dimension_numbers = #tpu.dot_dimension_numbers<[1], [1], [0], [0], [0, 0, 1, 0], [], []>} : vector<16x8xbf16>, vector<16x8xbf16>, vector<16x16xf32> -> vector<16x16xf32>
    %c0_34 = arith.constant 0 : index
    %c0_35 = arith.constant 0 : index
    %67 = vector.load %arg19[%c0_34, %c0_35] : memref<16x32xbf16, #tpu.memory_space<vmem>>, vector<16x8xbf16>
    %c0_36 = arith.constant 0 : index
    %c0_37 = arith.constant 0 : index
    %68 = vector.load %arg21[%c0_36, %c0_37] : memref<16x32xbf16, #tpu.memory_space<vmem>>, vector<16x8xbf16>
    %cst_38 = arith.constant dense<0.000000e+00> : vector<16x16xf32>
    %69 = tpu.matmul %67, %68, %cst_38 {dimension_numbers = #tpu.dot_dimension_numbers<[1], [1], [0], [0], [0, 0, 1, 0], [], []>} : vector<16x8xbf16>, vector<16x8xbf16>, vector<16x16xf32> -> vector<16x16xf32>
    %70 = arith.addf %66, %69 : vector<16x16xf32>
    %71 = arith.addf %70, %63 : vector<16x16xf32>
    %cst_39 = arith.constant dense<0xFF800000> : vector<16xf32>
    %72 = vector.multi_reduction <maximumf>, %71, %cst_39 [1] : vector<16x16xf32> to vector<16xf32>
    %73 = vector.shape_cast %72 : vector<16xf32> to vector<16x1xf32>
    %74 = vector.broadcast %73 : vector<16x1xf32> to vector<16x16xf32>
    %75 = arith.subf %71, %74 : vector<16x16xf32>
    %76 = math.exp %75 : vector<16x16xf32>
    %77 = arith.truncf %76 : vector<16x16xf32> to vector<16x16xbf16>
    %c0_40 = arith.constant 0 : index
    %c0_41 = arith.constant 0 : index
    %78 = vector.load %arg22[%c0_40, %c0_41] : memref<16x64xbf16, #tpu.memory_space<vmem>>, vector<16x16xbf16>
    %cst_42 = arith.constant dense<0.000000e+00> : vector<16x16xf32>
    %79 = tpu.matmul %77, %78, %cst_42 {dimension_numbers = #tpu.dot_dimension_numbers<[1], [0], [0], [1], [0, 0, 1, 1], [], []>} : vector<16x16xbf16>, vector<16x16xbf16>, vector<16x16xf32> -> vector<16x16xf32>
    %cst_43 = arith.constant dense<0.000000e+00> : vector<16xf32>
    %80 = vector.multi_reduction <add>, %76, %cst_43 [1] : vector<16x16xf32> to vector<16xf32>
    %81 = vector.shape_cast %80 : vector<16xf32> to vector<16x1xf32>
    %82 = tpu.reciprocal %81 {approx = true} : vector<16x1xf32> -> vector<16x1xf32>
    %83 = vector.broadcast %82 : vector<16x1xf32> to vector<16x16xf32>
    %84 = arith.mulf %79, %83 : vector<16x16xf32>
    %85 = arith.truncf %84 : vector<16x16xf32> to vector<16x16xbf16>
    %c0_44 = arith.constant 0 : index
    %c0_45 = arith.constant 0 : index
    %86 = vector.load %arg23[%c0_44, %c0_45] : memref<16x64xbf16, #tpu.memory_space<vmem>>, vector<16x16xbf16>
    tpu.vector_store %arg23[%c0_44, %c0_45], %85 {strides = array<i32>} : memref<16x64xbf16, #tpu.memory_space<vmem>>, vector<16x16xbf16>,
    %c0_46 = arith.constant 0 : index
    %c8 = arith.constant 8 : index
    %87 = vector.load %arg18[%c0_46, %c8] : memref<16x32xbf16, #tpu.memory_space<vmem>>, vector<16x8xbf16>
    %c0_47 = arith.constant 0 : index
    %c8_48 = arith.constant 8 : index
    %88 = vector.load %arg20[%c0_47, %c8_48] : memref<16x32xbf16, #tpu.memory_space<vmem>>, vector<16x8xbf16>
    %cst_49 = arith.constant dense<0.000000e+00> : vector<16x16xf32>
    %89 = tpu.matmul %87, %88, %cst_49 {dimension_numbers = #tpu.dot_dimension_numbers<[1], [1], [0], [0], [0, 0, 1, 0], [], []>} : vector<16x8xbf16>, vector<16x8xbf16>, vector<16x16xf32> -> vector<16x16xf32>
    %c0_50 = arith.constant 0 : index
    %c8_51 = arith.constant 8 : index
    %90 = vector.load %arg19[%c0_50, %c8_51] : memref<16x32xbf16, #tpu.memory_space<vmem>>, vector<16x8xbf16>
    %c0_52 = arith.constant 0 : index
    %c8_53 = arith.constant 8 : index
    %91 = vector.load %arg21[%c0_52, %c8_53] : memref<16x32xbf16, #tpu.memory_space<vmem>>, vector<16x8xbf16>
    %cst_54 = arith.constant dense<0.000000e+00> : vector<16x16xf32>
    %92 = tpu.matmul %90, %91, %cst_54 {dimension_numbers = #tpu.dot_dimension_numbers<[1], [1], [0], [0], [0, 0, 1, 0], [], []>} : vector<16x8xbf16>, vector<16x8xbf16>, vector<16x16xf32> -> vector<16x16xf32>
    %93 = arith.addf %89, %92 : vector<16x16xf32>
    %94 = arith.addf %93, %63 : vector<16x16xf32>
    %cst_55 = arith.constant dense<0xFF800000> : vector<16xf32>
    %95 = vector.multi_reduction <maximumf>, %94, %cst_55 [1] : vector<16x16xf32> to vector<16xf32>
    %96 = vector.shape_cast %95 : vector<16xf32> to vector<16x1xf32>
    %97 = vector.broadcast %96 : vector<16x1xf32> to vector<16x16xf32>
    %98 = arith.subf %94, %97 : vector<16x16xf32>
    %99 = math.exp %98 : vector<16x16xf32>
    %100 = arith.truncf %99 : vector<16x16xf32> to vector<16x16xbf16>
    %c0_56 = arith.constant 0 : index
    %c16 = arith.constant 16 : index
    %101 = vector.load %arg22[%c0_56, %c16] : memref<16x64xbf16, #tpu.memory_space<vmem>>, vector<16x16xbf16>
    %cst_57 = arith.constant dense<0.000000e+00> : vector<16x16xf32>
    %102 = tpu.matmul %100, %101, %cst_57 {dimension_numbers = #tpu.dot_dimension_numbers<[1], [0], [0], [1], [0, 0, 1, 1], [], []>} : vector<16x16xbf16>, vector<16x16xbf16>, vector<16x16xf32> -> vector<16x16xf32>
    %cst_58 = arith.constant dense<0.000000e+00> : vector<16xf32>
    %103 = vector.multi_reduction <add>, %99, %cst_58 [1] : vector<16x16xf32> to vector<16xf32>
    %104 = vector.shape_cast %103 : vector<16xf32> to vector<16x1xf32>
    %105 = tpu.reciprocal %104 {approx = true} : vector<16x1xf32> -> vector<16x1xf32>
    %106 = vector.broadcast %105 : vector<16x1xf32> to vector<16x16xf32>
    %107 = arith.mulf %102, %106 : vector<16x16xf32>
    %108 = arith.truncf %107 : vector<16x16xf32> to vector<16x16xbf16>
    %c0_59 = arith.constant 0 : index
    %c16_60 = arith.constant 16 : index
    %109 = vector.load %arg23[%c0_59, %c16_60] : memref<16x64xbf16, #tpu.memory_space<vmem>>, vector<16x16xbf16>
    tpu.vector_store %arg23[%c0_59, %c16_60], %108 {strides = array<i32>} : memref<16x64xbf16, #tpu.memory_space<vmem>>, vector<16x16xbf16>,
    %c0_61 = arith.constant 0 : index
    %c16_62 = arith.constant 16 : index
    %110 = vector.load %arg18[%c0_61, %c16_62] : memref<16x32xbf16, #tpu.memory_space<vmem>>, vector<16x8xbf16>
    %c0_63 = arith.constant 0 : index
    %c16_64 = arith.constant 16 : index
    %111 = vector.load %arg20[%c0_63, %c16_64] : memref<16x32xbf16, #tpu.memory_space<vmem>>, vector<16x8xbf16>
    %cst_65 = arith.constant dense<0.000000e+00> : vector<16x16xf32>
    %112 = tpu.matmul %110, %111, %cst_65 {dimension_numbers = #tpu.dot_dimension_numbers<[1], [1], [0], [0], [0, 0, 1, 0], [], []>} : vector<16x8xbf16>, vector<16x8xbf16>, vector<16x16xf32> -> vector<16x16xf32>
    %c0_66 = arith.constant 0 : index
    %c16_67 = arith.constant 16 : index
    %113 = vector.load %arg19[%c0_66, %c16_67] : memref<16x32xbf16, #tpu.memory_space<vmem>>, vector<16x8xbf16>
    %c0_68 = arith.constant 0 : index
    %c16_69 = arith.constant 16 : index
    %114 = vector.load %arg21[%c0_68, %c16_69] : memref<16x32xbf16, #tpu.memory_space<vmem>>, vector<16x8xbf16>
    %cst_70 = arith.constant dense<0.000000e+00> : vector<16x16xf32>
    %115 = tpu.matmul %113, %114, %cst_70 {dimension_numbers = #tpu.dot_dimension_numbers<[1], [1], [0], [0], [0, 0, 1, 0], [], []>} : vector<16x8xbf16>, vector<16x8xbf16>, vector<16x16xf32> -> vector<16x16xf32>
    %116 = arith.addf %112, %115 : vector<16x16xf32>
    %117 = arith.addf %116, %63 : vector<16x16xf32>
    %cst_71 = arith.constant dense<0xFF800000> : vector<16xf32>
    %118 = vector.multi_reduction <maximumf>, %117, %cst_71 [1] : vector<16x16xf32> to vector<16xf32>
    %119 = vector.shape_cast %118 : vector<16xf32> to vector<16x1xf32>
    %120 = vector.broadcast %119 : vector<16x1xf32> to vector<16x16xf32>
    %121 = arith.subf %117, %120 : vector<16x16xf32>
    %122 = math.exp %121 : vector<16x16xf32>
    %123 = arith.truncf %122 : vector<16x16xf32> to vector<16x16xbf16>
    %c0_72 = arith.constant 0 : index
    %c32 = arith.constant 32 : index
    %124 = vector.load %arg22[%c0_72, %c32] : memref<16x64xbf16, #tpu.memory_space<vmem>>, vector<16x16xbf16>
    %cst_73 = arith.constant dense<0.000000e+00> : vector<16x16xf32>
    %125 = tpu.matmul %123, %124, %cst_73 {dimension_numbers = #tpu.dot_dimension_numbers<[1], [0], [0], [1], [0, 0, 1, 1], [], []>} : vector<16x16xbf16>, vector<16x16xbf16>, vector<16x16xf32> -> vector<16x16xf32>
    %cst_74 = arith.constant dense<0.000000e+00> : vector<16xf32>
    %126 = vector.multi_reduction <add>, %122, %cst_74 [1] : vector<16x16xf32> to vector<16xf32>
    %127 = vector.shape_cast %126 : vector<16xf32> to vector<16x1xf32>
    %128 = tpu.reciprocal %127 {approx = true} : vector<16x1xf32> -> vector<16x1xf32>
    %129 = vector.broadcast %128 : vector<16x1xf32> to vector<16x16xf32>
    %130 = arith.mulf %125, %129 : vector<16x16xf32>
    %131 = arith.truncf %130 : vector<16x16xf32> to vector<16x16xbf16>
    %c0_75 = arith.constant 0 : index
    %c32_76 = arith.constant 32 : index
    %132 = vector.load %arg23[%c0_75, %c32_76] : memref<16x64xbf16, #tpu.memory_space<vmem>>, vector<16x16xbf16>
    tpu.vector_store %arg23[%c0_75, %c32_76], %131 {strides = array<i32>} : memref<16x64xbf16, #tpu.memory_space<vmem>>, vector<16x16xbf16>,
    %c0_77 = arith.constant 0 : index
    %c24 = arith.constant 24 : index
    %133 = vector.load %arg18[%c0_77, %c24] : memref<16x32xbf16, #tpu.memory_space<vmem>>, vector<16x8xbf16>
    %c0_78 = arith.constant 0 : index
    %c24_79 = arith.constant 24 : index
    %134 = vector.load %arg20[%c0_78, %c24_79] : memref<16x32xbf16, #tpu.memory_space<vmem>>, vector<16x8xbf16>
    %cst_80 = arith.constant dense<0.000000e+00> : vector<16x16xf32>
    %135 = tpu.matmul %133, %134, %cst_80 {dimension_numbers = #tpu.dot_dimension_numbers<[1], [1], [0], [0], [0, 0, 1, 0], [], []>} : vector<16x8xbf16>, vector<16x8xbf16>, vector<16x16xf32> -> vector<16x16xf32>
    %c0_81 = arith.constant 0 : index
    %c24_82 = arith.constant 24 : index
    %136 = vector.load %arg19[%c0_81, %c24_82] : memref<16x32xbf16, #tpu.memory_space<vmem>>, vector<16x8xbf16>
    %c0_83 = arith.constant 0 : index
    %c24_84 = arith.constant 24 : index
    %137 = vector.load %arg21[%c0_83, %c24_84] : memref<16x32xbf16, #tpu.memory_space<vmem>>, vector<16x8xbf16>
    %cst_85 = arith.constant dense<0.000000e+00> : vector<16x16xf32>
    %138 = tpu.matmul %136, %137, %cst_85 {dimension_numbers = #tpu.dot_dimension_numbers<[1], [1], [0], [0], [0, 0, 1, 0], [], []>} : vector<16x8xbf16>, vector<16x8xbf16>, vector<16x16xf32> -> vector<16x16xf32>
    %139 = arith.addf %135, %138 : vector<16x16xf32>
    %140 = arith.addf %139, %63 : vector<16x16xf32>
    %cst_86 = arith.constant dense<0xFF800000> : vector<16xf32>
    %141 = vector.multi_reduction <maximumf>, %140, %cst_86 [1] : vector<16x16xf32> to vector<16xf32>
    %142 = vector.shape_cast %141 : vector<16xf32> to vector<16x1xf32>
    %143 = vector.broadcast %142 : vector<16x1xf32> to vector<16x16xf32>
    %144 = arith.subf %140, %143 : vector<16x16xf32>
    %145 = math.exp %144 : vector<16x16xf32>
    %146 = arith.truncf %145 : vector<16x16xf32> to vector<16x16xbf16>
    %c0_87 = arith.constant 0 : index
    %c48 = arith.constant 48 : index
    %147 = vector.load %arg22[%c0_87, %c48] : memref<16x64xbf16, #tpu.memory_space<vmem>>, vector<16x16xbf16>
    %cst_88 = arith.constant dense<0.000000e+00> : vector<16x16xf32>
    %148 = tpu.matmul %146, %147, %cst_88 {dimension_numbers = #tpu.dot_dimension_numbers<[1], [0], [0], [1], [0, 0, 1, 1], [], []>} : vector<16x16xbf16>, vector<16x16xbf16>, vector<16x16xf32> -> vector<16x16xf32>
    %cst_89 = arith.constant dense<0.000000e+00> : vector<16xf32>
    %149 = vector.multi_reduction <add>, %145, %cst_89 [1] : vector<16x16xf32> to vector<16xf32>
    %150 = vector.shape_cast %149 : vector<16xf32> to vector<16x1xf32>
    %151 = tpu.reciprocal %150 {approx = true} : vector<16x1xf32> -> vector<16x1xf32>
    %152 = vector.broadcast %151 : vector<16x1xf32> to vector<16x16xf32>
    %153 = arith.mulf %148, %152 : vector<16x16xf32>
    %154 = arith.truncf %153 : vector<16x16xf32> to vector<16x16xbf16>
    %c0_90 = arith.constant 0 : index
    %c48_91 = arith.constant 48 : index
    %155 = vector.load %arg23[%c0_90, %c48_91] : memref<16x64xbf16, #tpu.memory_space<vmem>>, vector<16x16xbf16>
    tpu.vector_store %arg23[%c0_90, %c48_91], %154 {strides = array<i32>} : memref<16x64xbf16, #tpu.memory_space<vmem>>, vector<16x16xbf16>,
    %c0_92 = arith.constant 0 : index
    %c0_93 = arith.constant 0 : index
    %156 = vector.load %arg23[%c0_92, %c0_93] : memref<16x64xbf16, #tpu.memory_space<vmem>>, vector<16x64xbf16>
    %c0_94 = arith.constant 0 : index
    %c0_95 = arith.constant 0 : index
    %157 = vector.load %arg5[%c0_94, %c0_95] : memref<64x64xbf16, #tpu.memory_space<vmem>>, vector<64x64xbf16>
    %cst_96 = arith.constant dense<0.000000e+00> : vector<16x64xf32>
    %158 = tpu.matmul %156, %157, %cst_96 {dimension_numbers = #tpu.dot_dimension_numbers<[1], [0], [0], [1], [0, 0, 1, 1], [], []>} : vector<16x64xbf16>, vector<64x64xbf16>, vector<16x64xf32> -> vector<16x64xf32>
    %c0_97 = arith.constant 0 : index
    %c0_98 = arith.constant 0 : index
    %159 = vector.load %arg6[%c0_97, %c0_98] : memref<1x64xf32, #tpu.memory_space<vmem>>, vector<1x64xf32>
    %160 = vector.broadcast %159 : vector<1x64xf32> to vector<16x64xf32>
    %161 = arith.addf %158, %160 : vector<16x64xf32>
    %162 = arith.addf %1, %161 : vector<16x64xf32>
    %c0_99 = arith.constant 0 : index
    %c0_100 = arith.constant 0 : index
    %163 = vector.load %arg13[%c0_99, %c0_100] : memref<1x64xf32, #tpu.memory_space<vmem>>, vector<1x64xf32>
    %c0_101 = arith.constant 0 : index
    %c0_102 = arith.constant 0 : index
    %164 = vector.load %arg14[%c0_101, %c0_102] : memref<1x64xf32, #tpu.memory_space<vmem>>, vector<1x64xf32>
    %cst_103 = arith.constant dense<0.000000e+00> : vector<16xf32>
    %165 = vector.multi_reduction <add>, %162, %cst_103 [1] : vector<16x64xf32> to vector<16xf32>
    %166 = vector.shape_cast %165 : vector<16xf32> to vector<16x1xf32>
    %cst_104 = arith.constant 6.400000e+01 : f32
    %167 = vector.broadcast %cst_104 : f32 to vector<16x1xf32>
    %168 = arith.divf %166, %167 : vector<16x1xf32>
    %169 = vector.broadcast %168 : vector<16x1xf32> to vector<16x64xf32>
    %170 = arith.subf %162, %169 : vector<16x64xf32>
    %171 = arith.mulf %170, %170 : vector<16x64xf32>
    %cst_105 = arith.constant dense<0.000000e+00> : vector<16xf32>
    %172 = vector.multi_reduction <add>, %171, %cst_105 [1] : vector<16x64xf32> to vector<16xf32>
    %173 = vector.shape_cast %172 : vector<16xf32> to vector<16x1xf32>
    %cst_106 = arith.constant 6.400000e+01 : f32
    %174 = vector.broadcast %cst_106 : f32 to vector<16x1xf32>
    %175 = arith.divf %173, %174 : vector<16x1xf32>
    %176 = vector.broadcast %168 : vector<16x1xf32> to vector<16x64xf32>
    %177 = arith.subf %162, %176 : vector<16x64xf32>
    %cst_107 = arith.constant 9.99999974E-6 : f32
    %178 = vector.broadcast %cst_107 : f32 to vector<16x1xf32>
    %179 = arith.addf %175, %178 : vector<16x1xf32>
    %180 = math.rsqrt %179 : vector<16x1xf32>
    %181 = vector.broadcast %180 : vector<16x1xf32> to vector<16x64xf32>
    %182 = arith.mulf %177, %181 : vector<16x64xf32>
    %183 = vector.broadcast %163 : vector<1x64xf32> to vector<16x64xf32>
    %184 = arith.mulf %182, %183 : vector<16x64xf32>
    %185 = vector.broadcast %164 : vector<1x64xf32> to vector<16x64xf32>
    %186 = arith.addf %184, %185 : vector<16x64xf32>
    %187 = arith.truncf %186 : vector<16x64xf32> to vector<16x64xbf16>
    %c0_108 = arith.constant 0 : index
    %c0_109 = arith.constant 0 : index
    %188 = vector.load %arg7[%c0_108, %c0_109] : memref<64x128xbf16, #tpu.memory_space<vmem>>, vector<64x128xbf16>
    %cst_110 = arith.constant dense<0.000000e+00> : vector<16x128xf32>
    %189 = tpu.matmul %187, %188, %cst_110 {dimension_numbers = #tpu.dot_dimension_numbers<[1], [0], [0], [1], [0, 0, 1, 1], [], []>} : vector<16x64xbf16>, vector<64x128xbf16>, vector<16x128xf32> -> vector<16x128xf32>
    %c0_111 = arith.constant 0 : index
    %c0_112 = arith.constant 0 : index
    %190 = vector.load %arg8[%c0_111, %c0_112] : memref<1x128xf32, #tpu.memory_space<vmem>>, vector<1x128xf32>
    %191 = vector.broadcast %190 : vector<1x128xf32> to vector<16x128xf32>
    %192 = arith.addf %189, %191 : vector<16x128xf32>
    %cst_113 = arith.constant 5.000000e-01 : f32
    %193 = vector.broadcast %cst_113 : f32 to vector<16x128xf32>
    %194 = arith.mulf %193, %192 : vector<16x128xf32>
    %cst_114 = arith.constant 0.707106769 : f32
    %195 = vector.broadcast %cst_114 : f32 to vector<16x128xf32>
    %196 = arith.mulf %192, %195 : vector<16x128xf32>
    %197 = math.erf %196 : vector<16x128xf32>
    %cst_115 = arith.constant 1.000000e+00 : f32
    %198 = vector.broadcast %cst_115 : f32 to vector<16x128xf32>
    %199 = arith.addf %198, %197 : vector<16x128xf32>
    %200 = arith.mulf %194, %199 : vector<16x128xf32>
    %201 = arith.truncf %200 : vector<16x128xf32> to vector<16x128xbf16>
    %c0_116 = arith.constant 0 : index
    %c0_117 = arith.constant 0 : index
    %202 = vector.load %arg9[%c0_116, %c0_117] : memref<128x64xbf16, #tpu.memory_space<vmem>>, vector<128x64xbf16>
    %cst_118 = arith.constant dense<0.000000e+00> : vector<16x64xf32>
    %203 = tpu.matmul %201, %202, %cst_118 {dimension_numbers = #tpu.dot_dimension_numbers<[1], [0], [0], [1], [0, 0, 1, 1], [], []>} : vector<16x128xbf16>, vector<128x64xbf16>, vector<16x64xf32> -> vector<16x64xf32>
    %c0_119 = arith.constant 0 : index
    %c0_120 = arith.constant 0 : index
    %204 = vector.load %arg10[%c0_119, %c0_120] : memref<1x64xf32, #tpu.memory_space<vmem>>, vector<1x64xf32>
    %205 = vector.broadcast %204 : vector<1x64xf32> to vector<16x64xf32>
    %206 = arith.addf %203, %205 : vector<16x64xf32>
    %207 = arith.addf %162, %206 : vector<16x64xf32>
    %c0_121 = arith.constant 0 : index
    %c0_122 = arith.constant 0 : index
    %c0_123 = arith.constant 0 : index
    %208 = vector.load %arg17[%c0_121, %c0_122, %c0_123] : memref<1x16x64xf32, #tpu.memory_space<vmem>>, vector<1x16x64xf32>
    %209 = vector.shape_cast %208 : vector<1x16x64xf32> to vector<16x64xf32>
    %210 = vector.shape_cast %207 : vector<16x64xf32> to vector<1x16x64xf32>
    tpu.vector_store %arg17[%c0_121, %c0_122, %c0_123], %210 {strides = array<i32>} : memref<1x16x64xf32, #tpu.memory_space<vmem>>, vector<1x16x64xf32>,
    return
  }
  func.func @transform_0(%arg0: i32) -> (i32, i32, i32) {
    %c0_i32 = arith.constant 0 : i32
    %c0_i32_0 = arith.constant 0 : i32
    %c0_i32_1 = arith.constant 0 : i32
    return %arg0, %c0_i32, %c0_i32_0 : i32, i32, i32
  }
  func.func @transform_1(%arg0: i32) -> (i32, i32) {
    %c0_i32 = arith.constant 0 : i32
    %c0_i32_0 = arith.constant 0 : i32
    %c0_i32_1 = arith.constant 0 : i32
    return %c0_i32, %c0_i32_0 : i32, i32
  }
  func.func @transform_2(%arg0: i32) -> (i32, i32) {
    %c0_i32 = arith.constant 0 : i32
    %c0_i32_0 = arith.constant 0 : i32
    %c0_i32_1 = arith.constant 0 : i32
    return %c0_i32, %c0_i32_0 : i32, i32
  }
  func.func @transform_3(%arg0: i32) -> (i32, i32) {
    %c0_i32 = arith.constant 0 : i32
    %c0_i32_0 = arith.constant 0 : i32
    %c0_i32_1 = arith.constant 0 : i32
    return %c0_i32, %c0_i32_0 : i32, i32
  }
  func.func @transform_4(%arg0: i32) -> (i32, i32) {
    %c0_i32 = arith.constant 0 : i32
    %c0_i32_0 = arith.constant 0 : i32
    %c0_i32_1 = arith.constant 0 : i32
    return %c0_i32, %c0_i32_0 : i32, i32
  }
  func.func @transform_5(%arg0: i32) -> (i32, i32) {
    %c0_i32 = arith.constant 0 : i32
    %c0_i32_0 = arith.constant 0 : i32
    %c0_i32_1 = arith.constant 0 : i32
    return %c0_i32, %c0_i32_0 : i32, i32
  }
  func.func @transform_6(%arg0: i32) -> (i32, i32) {
    %c0_i32 = arith.constant 0 : i32
    %c0_i32_0 = arith.constant 0 : i32
    %c0_i32_1 = arith.constant 0 : i32
    return %c0_i32, %c0_i32_0 : i32, i32
  }
  func.func @transform_7(%arg0: i32) -> (i32, i32) {
    %c0_i32 = arith.constant 0 : i32
    %c0_i32_0 = arith.constant 0 : i32
    %c0_i32_1 = arith.constant 0 : i32
    return %c0_i32, %c0_i32_0 : i32, i32
  }
  func.func @transform_8(%arg0: i32) -> (i32, i32) {
    %c0_i32 = arith.constant 0 : i32
    %c0_i32_0 = arith.constant 0 : i32
    %c0_i32_1 = arith.constant 0 : i32
    return %c0_i32, %c0_i32_0 : i32, i32
  }
  func.func @transform_9(%arg0: i32) -> (i32, i32) {
    %c0_i32 = arith.constant 0 : i32
    %c0_i32_0 = arith.constant 0 : i32
    %c0_i32_1 = arith.constant 0 : i32
    return %c0_i32, %c0_i32_0 : i32, i32
  }
  func.func @transform_10(%arg0: i32) -> (i32, i32) {
    %c0_i32 = arith.constant 0 : i32
    %c0_i32_0 = arith.constant 0 : i32
    %c0_i32_1 = arith.constant 0 : i32
    return %c0_i32, %c0_i32_0 : i32, i32
  }
  func.func @transform_11(%arg0: i32) -> (i32, i32) {
    %c0_i32 = arith.constant 0 : i32
    %c0_i32_0 = arith.constant 0 : i32
    %c0_i32_1 = arith.constant 0 : i32
    return %c0_i32, %c0_i32_0 : i32, i32
  }
  func.func @transform_12(%arg0: i32) -> (i32, i32) {
    %c0_i32 = arith.constant 0 : i32
    %c0_i32_0 = arith.constant 0 : i32
    %c0_i32_1 = arith.constant 0 : i32
    return %c0_i32, %c0_i32_0 : i32, i32
  }
  func.func @transform_13(%arg0: i32) -> (i32, i32) {
    %c0_i32 = arith.constant 0 : i32
    %c0_i32_0 = arith.constant 0 : i32
    %c0_i32_1 = arith.constant 0 : i32
    return %c0_i32, %c0_i32_0 : i32, i32
  }
  func.func @transform_14(%arg0: i32) -> (i32, i32) {
    %c0_i32 = arith.constant 0 : i32
    %c0_i32_0 = arith.constant 0 : i32
    %c0_i32_1 = arith.constant 0 : i32
    return %c0_i32, %c0_i32_0 : i32, i32
  }
  func.func @transform_15(%arg0: i32) -> (i32, i32) {
    %c0_i32 = arith.constant 0 : i32
    %c0_i32_0 = arith.constant 0 : i32
    %c0_i32_1 = arith.constant 0 : i32
    return %c0_i32, %c0_i32_0 : i32, i32
  }
  func.func @transform_16(%arg0: i32) -> (i32, i32, i32) {
    %c0_i32 = arith.constant 0 : i32
    %c0_i32_0 = arith.constant 0 : i32
    %c0_i32_1 = arith.constant 0 : i32
    return %arg0, %c0_i32, %c0_i32_0 : i32, i32, i32
  }
}

</mosaic_0001>

<bundles_post_ra>
// kernel: tpu_custom_call.1
= control target key start
LH: loop header
LB: loop body
LE: loop exit
PB: predicated region body
PF: predicated region fallthrough
CT: control target
= control target key end

     0   :  { %6 = vsyncpa [#allocation3], 0  ;;  %s448_s0 = inlined_call_operand.hbm [shape: f32[8,128], index: 0, kind: input, shape index: {}]   ;;  %s449_s1 = inlined_call_operand.hbm [shape: f32[16,128], index: 1, kind: output, shape index: {}]  }
   0x1   :  { %7 = vsyncpa [#allocation4], 0 }
   0x2   :  { %9 = vsyncpa [#allocation4 + $0x1], 0  ;;  %s348_s6 = smov 0   ;;  %s350_s7 = smov 0  }
   0x3   :  { %s352_s8 = smov 0   ;;  %s354_s9 = smov 0  }
   0x4 LB: > { %s369_s10 = sadd.s32 4294967295, %s334_s9   ;;  %s184_s11 = sadd.s32 4294967294, %s334_s9   ;;  %s334_s9 = sphi %s354_s9, %s457_s9   ;;  %s330_s8 = sphi %s352_s8, %s456_s8   ;;  %s326_s7 = sphi %s350_s7, %s455_s7   ;;  %s322_s6 = sphi %s348_s6, %s454_s6  }
   0x5   : > { %s373_s12 = sadd.s32 1, %s334_s9   ;;  %s43_s13 = sadd.s32 1, %s330_s8 }
   0x6   : > { %s40_s14 = ssub.s32 %s334_s9, %s373_s12  ;;  %p53_p0 = scmp.ne.s32.totalorder %s330_s8, %s326_s7 }
   0x7   : > { %p41_p1 = scmp.eq.s32.totalorder %s40_s14, 0  ;;  %p54_p2 = scmp.eq.s32.totalorder %s369_s10, 1 }
   0x8   : > { %p59_p3 = scmp.ne.s32.totalorder %s326_s7, %s322_s6  ;;  %p60_p4 = scmp.eq.s32.totalorder %s184_s11, 1 }
   0x9   : > { %s384_s15 = scalar_select %p41_p1, %s330_s8, %s43_s13  }
   0xa   : > { %p386_p5 = por %p54_p2, %p53_p0  ;;  %p390_p6 = por %p60_p4, %p59_p3 }
   0xb   : > { %p185_p7 = scmp.ge.s32.totalorder %s334_s9, 1  ;;  %p67_p8 = scmp.lt.s32.totalorder %s334_s9, 3 }
   0xc   : > { %s451_s17 = scalar_select %p390_p6, 1, 0 }
   0xd   : > { %p208_p9 = scmp.eq.s32.totalorder %s369_s10, 0  ;;  %p397_p10 = pnand %p185_p7, %p67_p8 }
   0xe   : > { %s336_s19 = smov [#allocation2]  }
   0xf   : > { %s80_s20 = sshll.u32 %s336_s19, 4  ;;  %p200_p11 = pneg %p397_p10  ;;  %s81_s20 = int_to_ptr.vmem [resolvable:$true] %s80_s20 }
  0x10   : > { %s255_s21 = scalar_lea.vmem %s81_s20, 128  ;;  %p263_p3 = scmp.lt.s32.totalorder %s81_s20, %s81_s20 }
  0x11   : > { %p201_p12 = pnand %p208_p9, %p200_p11  ;;  %p256_p0 = scmp.ne.s32.totalorder %s81_s20, %s255_s21 }
  0x12   : > { %p264_p4 = scmp.lt.s32.totalorder %s255_s21, %s255_s21 }
  0x13   : > { %p246_p13 = pneg %p201_p12 }
  0x14   : > { %p265_p6 = por %p264_p4, %p263_p3 }
  0x15   : > { %p258_p1 = pnand %p256_p0, %p246_p13 }
  0x17   : > { %p259_p2 = pneg %p258_p1 }
  0x19   : > { %p266_p7 = pnand %p265_p6, %p259_p2 }
  0x1b   : > { %269 = shalt.err (!%p266_p7)
}
  0x1c   : > { %203 = dma.hbm_to_vmem [thread:$0]  (!%p201_p12), %s448_s0, 128, %s81_s20, [#allocation3]  }
  0x1d   : > { %93 = sbr.rel (%p397_p10) target bundleno = 60 (0x3c), region = 24 }
  0x22   : > { %313 = dma.done.wait (%p208_p9), [#allocation3], 128  }
  0x23   : > { %315 = vsyncadd (%p208_p9), [#allocation3], 4294967168  ;;  %s105_s24 = sand.u32 1, %s326_s7   ;;  %s191_s28 = sshll.u32 %s369_s10, 7  ;;  %v108_v0 = vld [vmem:[#allocation2] sm:$0xff] }
  0x24   : > { %s189_s25 = sshll.u32 %s105_s24, 3  ;;  %v109_v1 = vadd.f32 1.0, %v108_v0  ;;  %s123_s2 = scalar_lea.hbm %s449_s1, %s191_s28 }
  0x25   : > { %s107_s26 = scalar_lea.vmem [#allocation5], %s189_s25  ;;  %s112_s3 = scalar_lea.sflag [#allocation4], %s105_s24 }
  0x26   : > { %s125_s27 = sshll.u32 %s107_s26, 4  ;;  %110 = vst [vmem:[%s107_s26] sm:$0xff] %v109_v1  ;;  %s337_s5 = smov [#allocation5]   ;;  %s126_s27 = int_to_ptr.vmem [resolvable:$true] %s125_s27 }
  0x27   : > { %s270_s4 = scalar_lea.vmem %s126_s27, 128  ;;  %s274_s11 = sshll.u32 %s337_s5, 4  ;;  %s275_s11 = int_to_ptr.vmem [resolvable:$false] %s274_s11 }
  0x28   : > { %p271_p6 = scmp.ne.s32.totalorder %s126_s27, %s270_s4  ;;  %s276_s13 = scalar_lea.vmem %s275_s11, 256 }
  0x29   : > { %p277_p10 = scmp.lt.s32.totalorder %s126_s27, %s275_s11  ;;  %p278_p11 = scmp.lt.s32.totalorder %s276_s13, %s270_s4 }
  0x2a   : > { %p272_p8 = pnand %p271_p6, %p386_p5 }
  0x2b   : > { %p279_p12 = por %p278_p11, %p277_p10 }
  0x2c   : > { %p273_p9 = pneg %p272_p8 }
  0x2e   : > { %p280_p13 = pnand %p279_p12, %p273_p9 }
  0x30   : > { %283 = shalt.err (!%p280_p13)
}
  0x31   : > { %s284_s10 = scalar_lea.hbm %s123_s2, 128  ;;  %s288_s19 = scalar_lea.hbm %s449_s1, 256 }
  0x32   : > { %p285_p0 = scmp.ne.s32.totalorder %s123_s2, %s284_s10  ;;  %p289_p3 = scmp.lt.s32.totalorder %s123_s2, %s449_s1 }
  0x33   : > { %p290_p4 = scmp.lt.s32.totalorder %s288_s19, %s284_s10 }
  0x34   : > { %p286_p1 = pnand %p285_p0, %p386_p5 }
  0x35   : > { %p291_p7 = por %p290_p4, %p289_p3 }
  0x36   : > { %p287_p2 = pneg %p286_p1 }
  0x38   : > { %p292_p6 = pnand %p291_p7, %p287_p2 }
  0x3a   : > { %295 = shalt.err (!%p292_p6)
}
  0x3b   : > { %198 = dma.vmem_to_hbm [thread:$0]  (%p386_p5), %s126_s27, 128, %s123_s2, %s112_s3  }
  0x3c PF: > { %p210_p8 = scmp.ge.s32.totalorder %s334_s9, 2  ;;  %s137_s22 = sand.u32 1, %s322_s6  }
  0x3d   : > { %p453_p9 = scmp.ne.s32.totalorder %s451_s17, 0  ;;  %s138_s23 = scalar_lea.sflag [#allocation4], %s137_s22 }
  0x3f   : > { %p205_p10 = pnand %p210_p8, %p453_p9 }
  0x41   : > { %p206_p11 = pneg %p205_p10 }
  0x43   : > { %317 = dma.done.wait (%p206_p11), %s138_s23, 128  }
  0x44   : > { %319 = vsyncadd (%p206_p11), %s138_s23, 4294967168  ;;  %p12_p12 = scmp.ge.s32.totalorder %s373_s12, 4   ;;  %s454_s6 = smov %s326_s7 }
  0x45   : > { %s455_s7 = smov %s330_s8  ;;  %s456_s8 = smov %s384_s15 }
  0x46   : > { %s457_s9 = smov %s373_s12  ;;  %14 = sbr.rel (!%p12_p12) target bundleno = 4 (0x4), region = 61 }
  0x4b   :  { %143 = vsyncpa [#allocation3], 1 }
  0x4c   :  { %145 = vsyncpa [#allocation3 + $0x1], 1 }
  0x4d   :  { %146 = vsyncpa [#allocation4], 1 }
  0x4e   :  { %148 = vsyncpa [#allocation4 + $0x1], 1 }

// kernel: tpu_custom_call.1
= control target key start
LH: loop header
LB: loop body
LE: loop exit
PB: predicated region body
PF: predicated region fallthrough
CT: control target
= control target key end

     0   :  { %s3491_s0 = inlined_call_operand.vmem [shape: f32[2,16,64], index: 0, kind: input, shape index: {}]   ;;  %s3492_s1 = inlined_call_operand.hbm [shape: f32[16,32], index: 1, kind: input, shape index: {}]   ;;  %s3493_s2 = inlined_call_operand.hbm [shape: f32[16,32], index: 2, kind: input, shape index: {}]   ;;  %s3494_s3 = inlined_call_operand.vmem [shape: bf16[64,192], index: 3, kind: input, shape index: {}]   ;;  %s3495_s4 = inlined_call_operand.hbm [shape: bf16[64,64], index: 4, kind: input, shape index: {}]   ;;  %s3496_s5 = inlined_call_operand.vmem [shape: f32[1,64], index: 5, kind: input, shape index: {}]   ;;  %s3497_s6 = inlined_call_operand.hbm [shape: bf16[64,128], index: 6, kind: input, shape index: {}]   ;;  %s3498_s7 = inlined_call_operand.vmem [shape: f32[1,128], index: 7, kind: input, shape index: {}]   ;;  %s3499_s8 = inlined_call_operand.vmem [shape: bf16[128,64], index: 8, kind: input, shape index: {}]   ;;  %s3500_s9 = inlined_call_operand.vmem [shape: f32[1,64], index: 9, kind: input, shape index: {}]   ;;  %s3501_s10 = inlined_call_operand.vmem [shape: f32[1,64], index: 10, kind: input, shape index: {}]   ;;  %s3502_s11 = inlined_call_operand.vmem [shape: f32[1,64], index: 11, kind: input, shape index: {}]   ;;  %s3503_s12 = inlined_call_operand.vmem [shape: f32[1,64], index: 12, kind: input, shape index: {}]   ;;  %s3504_s13 = inlined_call_operand.vmem [shape: f32[1,64], index: 13, kind: input, shape index: {}]   ;;  %s3505_s14 = inlined_call_operand.vmem [shape: f32[1,64], index: 14, kind: input, shape index: {}]   ;;  %s3506_s15 = inlined_call_operand.vmem [shape: f32[1,64], index: 15, kind: input, shape index: {}]   ;;  %s3507_s16 = inlined_call_operand.hbm [shape: f32[2,16,64], index: 16, kind: output, shape index: {}]  }
   0x1   :  { %3514 = sst [smem:[#allocation25_spill]] %s3491_s0 }
   0x2   :  { %21 = vsyncpa [#allocation9], 0 }
   0x3   :  { %22 = vsyncpa [#allocation12], 0 }
   0x4   :  { %23 = vsyncpa [#allocation15], 0 }
   0x5   :  { %24 = vsyncpa [#allocation10], 0 }
   0x6   :  { %26 = vsyncpa [#allocation10 + $0x1], 0  ;;  %s3009_s21 = smov 0   ;;  %s3011_s22 = smov 0  }
   0x7   :  { %s3013_s23 = smov 0   ;;  %s3015_s24 = smov 0  }
   0x8 LB: > { %3515 = sst [smem:[#allocation21_spill]] %s2894_s23  ;;  %s3030_s14 = sadd.s32 4294967295, %s2898_s24   ;;  %s2898_s24 = sphi %s3015_s24, %s3533_s24   ;;  %s2894_s23 = sphi %s3013_s23, %s3535_s23   ;;  %s2890_s22 = sphi %s3011_s22, %s3537_s22   ;;  %s2886_s21 = sphi %s3009_s21, %s3536_s21  }
   0x9   : > { %s2244_s15 = sadd.s32 4294967294, %s2898_s24   ;;  %s3034_s25 = sadd.s32 1, %s2898_s24  }
   0xa   : > { %3516 = sst [smem:[#allocation22_spill]] %s3034_s25  ;;  %s380_s26 = sadd.s32 1, %s2894_s23 }
   0xb   : > { %s377_s27 = ssub.s32 %s2898_s24, %s3034_s25  ;;  %p390_p0 = scmp.ne.s32.totalorder %s2894_s23, %s2890_s22 }
   0xc   : > { %p378_p1 = scmp.eq.s32.totalorder %s377_s27, 0  ;;  %p391_p2 = scmp.eq.s32.totalorder %s3030_s14, 1 }
   0xd   : > { %p396_p3 = scmp.ne.s32.totalorder %s2890_s22, %s2886_s21  ;;  %p397_p4 = scmp.eq.s32.totalorder %s2244_s15, 1 }
   0xe   : > { %s3045_s28 = scalar_select %p378_p1, %s2894_s23, %s380_s26  }
   0xf   : > { %p3047_p5 = por %p391_p2, %p390_p0  ;;  %p3051_p6 = por %p397_p4, %p396_p3 }
  0x10   : > { %3517 = sst [smem:[#allocation23_spill]] %s3045_s28  ;;  %p2245_p7 = scmp.ge.s32.totalorder %s2898_s24, 1 }
  0x11   : > { %s3518_s29 = scalar_select %p3047_p5, 1, 0 }
  0x12   : > { %s3519_s30 = scalar_select %p3051_p6, 1, 0 }
  0x13   : > { %p404_p8 = scmp.lt.s32.totalorder %s2898_s24, 3  ;;  %p3511_p9 = scmp.eq.s32.totalorder %s3030_s14, 0 }
  0x14   : > { %3520 = sst [smem:[#allocation24_spill]] %s3519_s30  ;;  %s2900_s17 = smov [#allocation11]  }
  0x15   : > { %p3058_p10 = pnand %p2245_p7, %p404_p8  ;;  %s429_s18 = sshll.u32 %s2900_s17, 4  ;;  %s430_s18 = int_to_ptr.vmem [resolvable:$true] %s429_s18 }
  0x16   : > { %s2901_s20 = smov [#allocation8]   ;;  %s2902_s26 = smov [#allocation13]  }
  0x17   : > { %p2546_p11 = pneg %p3058_p10  ;;  %s416_s15 = sshll.u32 %s2901_s20, 4  ;;  %s417_s15 = int_to_ptr.vmem [resolvable:$true] %s416_s15 }
  0x18   : > { %s445_s27 = sshll.u32 %s2902_s26, 4  ;;  %s2733_s28 = scalar_lea.vmem %s430_s18, 256  ;;  %s446_s27 = int_to_ptr.vmem [resolvable:$true] %s445_s27 }
  0x19   : > { %p3066_p12 = pnand %p3511_p9, %p2546_p11  ;;  %p2734_p0 = scmp.ne.s32.totalorder %s430_s18, %s2733_s28 }
  0x1a   : > { %p2741_p3 = scmp.lt.s32.totalorder %s430_s18, %s430_s18  ;;  %p2742_p4 = scmp.lt.s32.totalorder %s2733_s28, %s2733_s28 }
  0x1b   : > { %p2724_p13 = pneg %p3066_p12 }
  0x1c   : > { %p2743_p7 = por %p2742_p4, %p2741_p3 }
  0x1d   : > { %p2736_p1 = pnand %p2734_p0, %p2724_p13 }
  0x1f   : > { %p2737_p2 = pneg %p2736_p1 }
  0x21   : > { %p2744_p8 = pnand %p2743_p7, %p2737_p2 }
  0x23   : > { %2747 = shalt.err (!%p2744_p8)
}
  0x24   : > { %s2903_s17 = smov 128   ;;  %s2904_s20 = smov 8  }
  0x25   : > { %2552 = dma.hbm_to_vmem [thread:$0]  (!%p3066_p12), %s3493_s2, 256, %s430_s18, [#allocation12], %s2903_s17, %s2903_s17, %s2904_s20  }
  0x26   : > { %s2759_s25 = scalar_lea.vmem %s417_s15, 256  ;;  %p2767_p9 = scmp.lt.s32.totalorder %s417_s15, %s417_s15 }
  0x27   : > { %p2760_p11 = scmp.ne.s32.totalorder %s417_s15, %s2759_s25  ;;  %p2768_p6 = scmp.lt.s32.totalorder %s2759_s25, %s2759_s25 }
  0x29   : > { %p2762_p0 = pnand %p2760_p11, %p2724_p13  ;;  %p2769_p3 = por %p2768_p6, %p2767_p9 }
  0x2b   : > { %p2763_p1 = pneg %p2762_p0 }
  0x2d   : > { %p2770_p2 = pnand %p2769_p3, %p2763_p1 }
  0x2f   : > { %2773 = shalt.err (!%p2770_p2)
}
  0x30   : > { %2549 = dma.hbm_to_vmem [thread:$0]  (!%p3066_p12), %s3492_s1, 256, %s417_s15, [#allocation9], %s2903_s17, %s2903_s17, %s2904_s20  }
  0x31   : > { %s2785_s23 = scalar_lea.vmem %s446_s27, 512  ;;  %p2793_p11 = scmp.lt.s32.totalorder %s446_s27, %s446_s27 }
  0x32   : > { %p2786_p4 = scmp.ne.s32.totalorder %s446_s27, %s2785_s23  ;;  %p2794_p0 = scmp.lt.s32.totalorder %s2785_s23, %s2785_s23 }
  0x34   : > { %p2788_p7 = pnand %p2786_p4, %p2724_p13  ;;  %p2795_p5 = por %p2794_p0, %p2793_p11 }
  0x36   : > { %p2789_p8 = pneg %p2788_p7 }
  0x38   : > { %p2796_p6 = pnand %p2795_p5, %p2789_p8 }
  0x3a   : > { %2799 = shalt.err (!%p2796_p6)
}
  0x3b   : > { %s2905_s25 = smov 64   ;;  %s2906_s18 = smov 4  }
  0x3c   : > { %2555 = dma.hbm_to_vmem [thread:$0]  (!%p3066_p12), %s3495_s4, 512, %s446_s27, [#allocation12], %s2905_s25, %s2905_s25, %s2906_s18  }
  0x3d   : > { %s2907_s15 = smov [#allocation14]  }
  0x3e   : > { %s461_s17 = sshll.u32 %s2907_s15, 4  ;;  %s462_s17 = int_to_ptr.vmem [resolvable:$true] %s461_s17 }
  0x3f   : > { %s2811_s20 = scalar_lea.vmem %s462_s17, 512  ;;  %p2819_p5 = scmp.lt.s32.totalorder %s462_s17, %s462_s17 }
  0x40   : > { %p2812_p9 = scmp.ne.s32.totalorder %s462_s17, %s2811_s20  ;;  %p2820_p2 = scmp.lt.s32.totalorder %s2811_s20, %s2811_s20 }
  0x42   : > { %p2814_p1 = pnand %p2812_p9, %p2724_p13  ;;  %p2821_p4 = por %p2820_p2, %p2819_p5 }
  0x44   : > { %p2815_p3 = pneg %p2814_p1 }
  0x46   : > { %p2822_p7 = pnand %p2821_p4, %p2815_p3 }
  0x48   : > { %2825 = shalt.err (!%p2822_p7)
}
  0x49   : > { %2558 = dma.hbm_to_vmem [thread:$0]  (!%p3066_p12), %s3497_s6, 512, %s462_s17, [#allocation15], %s2905_s25, %s2905_s25, %s2906_s18  }
  0x4a   : > { %512 = sbr.rel (%p3058_p10) target bundleno = 3601 (0xe11), region = 84  ;;  %p3523_p8 = scmp.eq.s32.totalorder (!%p3058_p10), %s3030_s14, 0 }
  0x4f   : > { %2869 = dma.done.wait (%p3523_p8), [#allocation9], 256   ;;  %p3524_p13 = pmov %p3523_p8 }
  0x50   : > { %p3525_p11 = pmov %p3523_p8 }
  0x51   : > { %2871 = vsyncadd (%p3524_p13), [#allocation9], 4294967040 }
  0x52   : > { %2873 = dma.done.wait (%p3525_p11), [#allocation12], 768   ;;  %p3526_p0 = pmov %p3523_p8 }
  0x54   : > { %2875 = vsyncadd (%p3526_p0), [#allocation12], 4294966528  ;;  %p3527_p6 = pmov %p3526_p0 }
  0x55   : > { %p3528_p12 = pmov %p3526_p0 }
  0x56   : > { %2877 = dma.done.wait (%p3527_p6), [#allocation15], 512  }
  0x57   : > { %2879 = vsyncadd (%p3528_p12), [#allocation15], 4294966784  ;;  %p574_p10 = scmp.lt.s32.totalorder %s3030_s14, 1  ;;  %s3529_s18 = sld [smem:[#allocation25_spill]]  ;;  %vm588_vm0 = vcmask 523264   ;;  %v2908_v18 = vmov 0  }
  0x58   : > { %v2627_v14 = vld [vmem:[%s3494_s3 + $0x34] ss:$8 sps:$4 sm:$0xff]   ;;  %v2629_v15 = vld [vmem:[%s3494_s3 + $0x30] ss:$8 sps:$4 sm:$0xff]   ;;  %v2630_v16 = vld [vmem:[%s3494_s3 + $0x24] ss:$8 sps:$4 sm:$0xff]   ;;  %716 = vmatprep.mubr.bf16.mxu1 %v2908_v18 }
  0x59   : > { %s575_s0 = scalar_select %p574_p10, %s3030_s14, 1  ;;  %692 = vmatprep.subr.bf16.mxu1 %v2627_v14  ;;  %v2632_v17 = vld [vmem:[%s3494_s3 + $0x20] ss:$8 sps:$4 sm:$0xff]   ;;  %v2633_v19 = vld [vmem:[%s3494_s3 + $0x14] ss:$8 sps:$4 sm:$0xff]   ;;  %v2912_v44 = vmov 0.0  }
  0x5a   : > { %693 = vmatpush1.bf16.msra.mxu1 %v2629_v15  ;;  %v2635_v20 = vld [vmem:[%s3494_s3 + $0x10] ss:$8 sps:$4 sm:$0xff]   ;;  %v2636_v21 = vld [vmem:[%s3494_s3 + $0x4] ss:$8 sps:$4 sm:$0xff]   ;;  %v2638_v22 = vld [vmem:[%s3494_s3] ss:$8 sps:$4 sm:$0xff]   ;;  %2424 = vmatprep.subr.bf16.mxu0 %v2912_v44 }
  0x5b   : > { %s2349_s19 = sshll.u32 %s575_s0, 4  ;;  %694 = vmatprep.subr.bf16.mxu1 %v2630_v16  ;;  %v3155_v23 = vld [vmem:[#allocation11 + $0x8] sm:$0xff]  ;;  %v3157_v24 = vld [vmem:[#allocation11] sm:$0xff]  ;;  %s2909_s23 = smov 64   ;;  %v3163_v25 = vld [vmem:[#allocation8] sm:$0xff]  ;;  %vm884_vm1 = vcmask 519168  }
  0x5c   : > { %s2910_s0 = smov 96   ;;  %v3173_v26 = vld [vmem:[#allocation8 + $0x8] sm:$0xff]  ;;  %v2259_v35 = vld [vmem:[%s3501_s10] ss:$0 sm:$0xff]  ;;  %vm2913_vm2 = vmmov 0   ;;  %vm757_vm3 = vcmask 257024  }
  0x5d   : > { %s3123_s30 = scalar_lea.vmem %s3529_s18, %s2349_s19  ;;  %s2911_s19 = smov 32   ;;  %v2260_v39 = vld [vmem:[%s3502_s11] ss:$0 sm:$0xff]  ;;  %2426 = vmatprep.mubr.msk.bf16.mxu0 %vm2913_vm2, %v2912_v44  ;;  %vm914_vm4 = vcmask 64512   ;;  %vm1021_vm7 = vcmask 130048   ;;  %vm1105_vm8 = vcmask 125952  }
  0x5e   : > { %v580_v0 = vld [vmem:[%s3123_s30] sm:$0xff]  ;;  %v581_v1 = vld [vmem:[%s3123_s30 + $0x8] sm:$0xff]  ;;  %695 = vmatpush1.bf16.msra.mxu1 %v2632_v17  ;;  %s2915_s15 = smov 120   ;;  %s2916_s17 = smov 112   ;;  %vm1329_vm9 = vcmask 257152   ;;  %vm1553_vm10 = vcmask 388352  }
  0x5f   : > { %v589_v2 = vsel %vm588_vm0, %v580_v0, 0.0  ;;  %v592_v3 = vsel %vm588_vm0, %v581_v1, 0.0  ;;  %696 = vmatprep.subr.bf16.mxu1 %v2633_v19  ;;  %s2917_s20 = smov 104   ;;  %s2918_s28 = smov 80   ;;  %vm1777_vm11 = vcmask 519552  }
  0x60   : > { %590 = vadd.xlane.f32.xlu0 %v589_v2  ;;  %s2368_s18 = sshll.u32 %s3030_s14, 8  ;;  %p3530_p1 = scmp.ne.s32.totalorder %s3518_s29, 0 }
  0x62   : > { %697 = vmatpush1.bf16.msra.mxu1 %v2635_v20 }
  0x63   : > { %698 = vmatprep.subr.bf16.mxu1 %v2636_v21 }
  0x64   : > { %593 = vadd.xlane.f32.xlu0 %v592_v3 }
  0x66   : > { %699 = vmatpush1.bf16.msra.mxu1 %v2638_v22 }
  0x67   : > { %2412 = vmatprep.subr.bf16.mxu1 %v2912_v44 }
  0x7a   : > { %844 = vrot.lane.b32.xlu0 %v3157_v24, %s2909_s23 }
  0x7e   : > { %836 = vrot.lane.b32.xlu0 %v3163_v25, %s2910_s0 }
  0x82   : > { %762 = vrot.lane.b32.xlu0 %v3163_v25, %s2911_s19 }
  0x86   : > { %796 = vrot.lane.b32.xlu0 %v3163_v25, %s2909_s23 }
  0xe9   : > { %v591_v4 = vpop.xlane.xlu0 %590 }
  0xea   : > { %v596_v5 = vmul.f32 0.015625, %v591_v4 }
  0xec   : > { %v598_v6 = vsub.f32 %v580_v0, %v596_v5 }
  0xed   : > { %v594_v7 = vpop.xlane.xlu0 %593 }
  0xee   : > { %v597_v8 = vmul.f32 0.015625, %v594_v7  ;;  %v600_v9 = vmul.f32 %v598_v6, %v598_v6 }
  0xf0   : > { %v599_v10 = vsub.f32 %v581_v1, %v597_v8  ;;  %v602_v11 = vsel %vm588_vm0, %v600_v9, 0.0 }
  0xf1   : > { %603 = vadd.xlane.f32.xlu1 %v602_v11  ;;  %v845_v46 = vpop.permute.xlu0 %844 }
  0xf2   : > { %v601_v12 = vmul.f32 %v599_v10, %v599_v10 }
  0xf4   : > { %v605_v13 = vsel %vm588_vm0, %v601_v12, 0.0 }
  0xf5   : > { %606 = vadd.xlane.f32.xlu1 %v605_v13  ;;  %v837_v62 = vpop.permute.xlu0 %836 }
  0xf9   : > { %v763_v0 = vpop.permute.xlu0 %762 }
  0xfd   : > { %v797_v2 = vpop.permute.xlu0 %796 }
 0x106   : > { %846 = vrot.lane.b32.xlu1 %v3155_v23, %s2909_s23 }
 0x10a   : > { %804 = vrot.lane.b32.xlu1 %v3157_v24, %s2910_s0 }
 0x10e   : > { %806 = vrot.lane.b32.xlu1 %v3155_v23, %s2910_s0 }
 0x112   : > { %838 = vrot.lane.b32.xlu1 %v3173_v26, %s2910_s0 }
 0x116   : > { %764 = vrot.lane.b32.xlu1 %v3173_v26, %s2911_s19 }
 0x11a   : > { %798 = vrot.lane.b32.xlu1 %v3173_v26, %s2909_s23 }
 0x17a   : > { %v604_v27 = vpop.xlane.xlu1 %603 }
 0x17b   : > { %v608_v28 = vmul.f32 0.015625, %v604_v27 }
 0x17d   : > { %v610_v29 = vadd.f32 1e-05, %v608_v28 }
 0x17e   : > { %v607_v30 = vpop.xlane.xlu1 %606 }
 0x17f   : > { %2676 = vrsqrt.f32 %v610_v29  ;;  %v609_v31 = vmul.f32 0.015625, %v607_v30 }
 0x181   : > { %v611_v32 = vadd.f32 1e-05, %v609_v31 }
 0x182   : > { %v847_v45 = vpop.permute.xlu1 %846 }
 0x183   : > { %2678 = vrsqrt.f32 %v611_v32 }
 0x186   : > { %v805_v54 = vpop.permute.xlu1 %804 }
 0x18a   : > { %v807_v59 = vpop.permute.xlu1 %806 }
 0x18c   : > { %v2677_v33 = vpop.eup %2676 }
 0x18d   : > { %v614_v34 = vmul.f32 %v2677_v33, %v598_v6 }
 0x18e   : > { %v839_v63 = vpop.permute.xlu1 %838 }
 0x18f   : > { %v622_v38 = vmul.f32 %v2259_v35, %v614_v34 }
 0x190   : > { %v2679_v36 = vpop.eup %2678 }
 0x191   : > { %v615_v37 = vmul.f32 %v2679_v36, %v599_v10  ;;  %v630_v41 = vadd.f32 %v2260_v39, %v622_v38 }
 0x192   : > { %v765_v1 = vpop.permute.xlu1 %764 }
 0x193   : > { %v623_v40 = vmul.f32 %v2259_v35, %v615_v37 }
 0x195   : > { %v631_v42 = vadd.f32 %v2260_v39, %v623_v40 }
 0x196   : > { %v799_v4 = vpop.permute.xlu1 %798 }
 0x197   : > { %v632_v43 = vpack.c.bf16 %v631_v42, %v630_v41 }
 0x199   : > { %2269 = vmatmul.mubr.msk.bf16.vlgmr.msra.gmra.mxu1 %vm588_vm0, %v632_v43 }
 0x19a   : > { %2414 = vmatprep.mubr.msk.bf16.mxu1 %vm2913_vm2, %v2912_v44 }
 0x259   : > { %v3192_v47 = vpop.f32.mrf.mxu1 }
 0x25a   : > { %v850_v48 = vmul.f32 %v845_v46, %v3192_v47  ;;  %v770_v53 = vmul.f32 %v3192_v47, %v3157_v24  ;;  %v810_v58 = vmul.f32 %v805_v54, %v3192_v47  ;;  %v842_v3 = vmul.f32 %v837_v62, %v3192_v47 }
 0x25b   : > { %v720_v49 = vpop.f32.mrf.mxu1  ;;  %v768_v9 = vmul.f32 %v763_v0, %v3192_v47  ;;  %v802_v14 = vmul.f32 %v797_v2, %v3192_v47  ;;  %v727_v39 = vmul.f32 %v3192_v47, %v3163_v25  ;;  %v2914_v62 = vmov -1e+30  }
 0x25c   : > { %v2358_v50 = vpack.c.bf16 %v720_v49, %v720_v49  ;;  %854 = vrot.lane.b32.xlu0 %v850_v48, %s2911_s19 }
 0x25d   : > { %v3196_v51 = vpop.f32.mrf.mxu1 }
 0x25e   : > { %885 = vst.msk [vmem:[#allocation6] sm:$0xf] %vm884_vm1, %v2358_v50  ;;  %v851_v52 = vmul.f32 %v847_v45, %v3196_v51  ;;  %v771_v57 = vmul.f32 %v3196_v51, %v3155_v23  ;;  %v811_v60 = vmul.f32 %v807_v59, %v3196_v51  ;;  %v843_v8 = vmul.f32 %v839_v63, %v3196_v51 }
 0x25f   : > { %v724_v55 = vpop.f32.mrf.mxu1  ;;  %v769_v17 = vmul.f32 %v765_v1, %v3196_v51  ;;  %v803_v22 = vmul.f32 %v799_v4, %v3196_v51  ;;  %v728_v48 = vmul.f32 %v3196_v51, %v3173_v26 }
 0x260   : > { %v2359_v56 = vpack.c.bf16 %v724_v55, %v724_v55  ;;  %856 = vrot.lane.b32.xlu1 %v851_v52, %s2911_s19  ;;  %774 = vrot.lane.b32.xlu0 %v770_v53, %s2911_s19 }
 0x262   : > { %886 = vst.msk [vmem:[#allocation6 + $0x4] sm:$0xf] %vm884_vm1, %v2359_v56 }
 0x264   : > { %776 = vrot.lane.b32.xlu1 %v771_v57, %s2911_s19  ;;  %814 = vrot.lane.b32.xlu0 %v810_v58, %s2910_s0 }
 0x268   : > { %816 = vrot.lane.b32.xlu1 %v811_v60, %s2910_s0  ;;  %731 = vrot.lane.b32.xlu0 %v3157_v24, %s2911_s19 }
 0x269   : > { %v2639_v61 = vld [vmem:[#allocation6] sm:$0xff]  }
 0x26a   : > { %2425 = vmatpush3.bf16.msra.mxu0 %v2639_v61 }
 0x26b   : > { %2436 = vmatprep.subr.bf16.mxu0 %v2912_v44 }
 0x26c   : > { %733 = vrot.lane.b32.xlu1 %v3155_v23, %s2911_s19 }
 0x2ce   : > { %v855_v5 = vpop.permute.xlu0 %854 }
 0x2cf   : > { %v860_v6 = vadd.f32 %v855_v5, %v842_v3 }
 0x2d1   : > { %v2356_v7 = vpack.c.bf16 %v860_v6, %v860_v6 }
 0x2d2   : > { %v857_v10 = vpop.permute.xlu1 %856  ;;  %v775_v11 = vpop.permute.xlu0 %774 }
 0x2d3   : > { %v861_v12 = vadd.f32 %v857_v10, %v843_v8  ;;  %v780_v13 = vadd.f32 %v775_v11, %v768_v9  ;;  %868 = vrot.lane.b32.xlu0 %v2356_v7, %s2911_s19 }
 0x2d5   : > { %v2357_v15 = vpack.c.bf16 %v861_v12, %v861_v12  ;;  %v2352_v16 = vpack.c.bf16 %v780_v13, %v780_v13 }
 0x2d6   : > { %v777_v18 = vpop.permute.xlu1 %776  ;;  %v815_v19 = vpop.permute.xlu0 %814 }
 0x2d7   : > { %v781_v20 = vadd.f32 %v777_v18, %v769_v17  ;;  %v820_v21 = vsub.f32 %v802_v14, %v815_v19  ;;  %870 = vrot.lane.b32.xlu1 %v2357_v15, %s2911_s19  ;;  %788 = vrot.lane.b32.xlu0 %v2352_v16, %s2910_s0 }
 0x2d9   : > { %v2353_v23 = vpack.c.bf16 %v781_v20, %v781_v20  ;;  %v2354_v24 = vpack.c.bf16 %v820_v21, %v820_v21 }
 0x2da   : > { %v817_v27 = vpop.permute.xlu1 %816  ;;  %v732_v28 = vpop.permute.xlu0 %731 }
 0x2db   : > { %v821_v29 = vsub.f32 %v803_v22, %v817_v27  ;;  %790 = vrot.lane.b32.xlu1 %v2353_v23, %s2910_s0  ;;  %828 = vrot.lane.b32.xlu0 %v2354_v24, %s2909_s23  ;;  %v737_v31 = vmul.f32 %v732_v28, %v3192_v47 }
 0x2dd   : > { %v2355_v30 = vpack.c.bf16 %v821_v29, %v821_v29 }
 0x2de   : > { %v734_v32 = vpop.permute.xlu1 %733 }
 0x2df   : > { %830 = vrot.lane.b32.xlu1 %v2355_v30, %s2909_s23  ;;  %741 = vrot.lane.b32.xlu0 %v737_v31, %s2910_s0  ;;  %v738_v33 = vmul.f32 %v734_v32, %v3196_v51  ;;  %v887_v51 = vlaneseq  ;;  %s2919_s23 = smov 16  }
 0x2e1   : > { %v888_v55 = vshrl.u32 %v887_v51, 7  ;;  %v891_v56 = vand.u32 127, %v887_v51 }
 0x2e3   : > { %743 = vrot.lane.b32.xlu1 %v738_v33, %s2910_s0  ;;  %vm892_vm5 = vcmp.le.s32.totalorder %v891_v56, %v888_v55  ;;  %v889_v59 = vadd.s32 8, %v888_v55 }
 0x2e4   : > { %v3257_v63 = vsel %vm892_vm5, 0.0, %v2914_v62 }
 0x2e5   : > { %vm893_vm6 = vcmp.le.s32.totalorder %v891_v56, %v889_v59 }
 0x2e6   : > { %v3260_v4 = vsel %vm893_vm6, 0.0, %v2914_v62 }
 0x345   : > { %v869_v34 = vpop.permute.xlu0 %868 }
 0x346   : > { %874 = vst.msk [vmem:[#allocation5] sm:$0xf] %vm757_vm3, %v869_v34 }
 0x349   : > { %v871_v35 = vpop.permute.xlu1 %870  ;;  %v789_v36 = vpop.permute.xlu0 %788 }
 0x34a   : > { %875 = vst.msk [vmem:[#allocation5 + $0x4] sm:$0xf] %vm757_vm3, %v871_v35  ;;  %794 = vst.msk [vmem:[#allocation3] sm:$0xf] %vm757_vm3, %v789_v36 }
 0x34d   : > { %v791_v37 = vpop.permute.xlu1 %790  ;;  %v829_v38 = vpop.permute.xlu0 %828 }
 0x34e   : > { %795 = vst.msk [vmem:[#allocation3 + $0x4] sm:$0xf] %vm757_vm3, %v791_v37  ;;  %834 = vst.msk [vmem:[#allocation4] sm:$0xf] %vm757_vm3, %v829_v38 }
 0x351   : > { %v831_v40 = vpop.permute.xlu1 %830  ;;  %v742_v41 = vpop.permute.xlu0 %741  ;;  %v2640_v42 = vld [vmem:[#allocation5] sm:$0xff]  }
 0x352   : > { %835 = vst.msk [vmem:[#allocation4 + $0x4] sm:$0xf] %vm757_vm3, %v831_v40  ;;  %v747_v43 = vsub.f32 %v727_v39, %v742_v41  ;;  %v919_v45 = vsel %vm914_vm4, %v2640_v42, 0  ;;  %v2645_v11 = vld [vmem:[#allocation5] sm:$0xff]  }
 0x353   : > { %2413 = vmatpush3.bf16.xpose.msra.mxu1 %v919_v45 }
 0x354   : > { %v2350_v46 = vpack.c.bf16 %v747_v43, %v747_v43  ;;  %2418 = vmatprep.subr.bf16.mxu1 %v2912_v44 }
 0x355   : > { %v744_v49 = vpop.permute.xlu1 %743  ;;  %v2641_v50 = vld [vmem:[#allocation3] sm:$0xff]  }
 0x356   : > { %758 = vst.msk [vmem:[#allocation2] sm:$0xf] %vm757_vm3, %v2350_v46  ;;  %v748_v25 = vsub.f32 %v728_v48, %v744_v49  ;;  %v2647_v13 = vld [vmem:[#allocation3] sm:$0xff]  }
 0x358   : > { %v2351_v47 = vpack.c.bf16 %v748_v25, %v748_v25 }
 0x359   : > { %v2642_v52 = vld [vmem:[#allocation4] sm:$0xff]  }
 0x35a   : > { %759 = vst.msk [vmem:[#allocation2 + $0x4] sm:$0xf] %vm757_vm3, %v2351_v47  ;;  %2415 = vmatmul.mubr.msk.bf16.vlgmr.msra.gmra.mxu1 %vm914_vm4, %v2641_v50  ;;  %v976_v53 = vsel %vm914_vm4, %v2642_v52, 0  ;;  %v2644_v10 = vld [vmem:[#allocation4] sm:$0xff]   ;;  %v2648_v47 = vld [vmem:[#allocation5] sm:$0xff]   ;;  %v2649_v50 = vld [vmem:[#allocation6] sm:$0xff]  }
 0x35b   : > { %2419 = vmatpush3.bf16.xpose.msra.mxu1 %v976_v53  ;;  %2420 = vmatprep.mubr.msk.bf16.mxu1 %vm2913_vm2, %v2912_v44  ;;  %v2650_v52 = vld [vmem:[#allocation3] sm:$0xff]   ;;  %v2651_v53 = vld [vmem:[#allocation4] sm:$0xff]  }
 0x35c   : > { %2430 = vmatprep.subr.bf16.mxu1 %v2912_v44 }
 0x361   : > { %v2643_v26 = vld [vmem:[#allocation2] sm:$0xff]  }
 0x362   : > { %2421 = vmatmul.mubr.msk.bf16.vlgmr.msra.gmra.mxu1 %vm914_vm4, %v2643_v26  ;;  %v2646_v12 = vld [vmem:[#allocation2] sm:$0xff]  }
 0x363   : > { %2432 = vmatprep.mubr.msk.bf16.mxu1 %vm2913_vm2, %v2912_v44  ;;  %v2652_v26 = vld [vmem:[#allocation2] sm:$0xff]  }
 0x41a   : > { %v955_v54 = vpop.f32.mrf.mxu1 }
 0x41c   : > { %v2416_v57 = vpop.f32.mrf.mxu1 }
 0x41e   : > { %v958_v58 = vpop.f32.mrf.mxu1 }
 0x420   : > { %v2417_v60 = vpop.f32.mrf.mxu1 }
 0x422   : > { %v1012_v61 = vpop.f32.mrf.mxu1 }
 0x423   : > { %v1013_v0 = vadd.f32 %v1012_v61, %v955_v54 }
 0x424   : > { %v2422_v1 = vpop.f32.mrf.mxu1 }
 0x425   : > { %v1019_v2 = vadd.f32 %v1013_v0, %v3257_v63 }
 0x426   : > { %v1015_v3 = vpop.f32.mrf.mxu1 }
 0x427   : > { %v1016_v5 = vadd.f32 %v1015_v3, %v958_v58  ;;  %v1022_v6 = vsel %vm1021_vm7, %v1019_v2, -inf }
 0x428   : > { %1023 = vmax.xlane.f32.xlu0 %v1022_v6  ;;  %v2423_v7 = vpop.f32.mrf.mxu1 }
 0x429   : > { %v1020_v8 = vadd.f32 %v1016_v5, %v3260_v4 }
 0x42b   : > { %v1025_v9 = vsel %vm1021_vm7, %v1020_v8, -inf }
 0x42c   : > { %1026 = vmax.xlane.f32.xlu1 %v1025_v9 }
 0x43d   : > { %1189 = vrot.lane.b32.xlu1 %v2644_v10, %s2915_s15 }
 0x43e   : > { %1128 = vrot.lane.b32.xlu0 %v2645_v11, %s2915_s15 }
 0x441   : > { %1182 = vrot.lane.b32.xlu1 %v2646_v12, %s2915_s15 }
 0x442   : > { %1121 = vrot.lane.b32.xlu0 %v2647_v13, %s2915_s15 }
 0x4b1   : > { %v1024_v14 = vpop.xlane.xlu0 %1023 }
 0x4b2   : > { %v1028_v15 = vsub.f32 %v1019_v2, %v1024_v14 }
 0x4b4   : > { %v1030_v16 = vmul.f32 1.442695, %v1028_v15 }
 0x4b5   : > { %v1129_v17 = vpop.permute.xlu0 %1128  ;;  %v1027_v18 = vpop.xlane.xlu1 %1026 }
 0x4b6   : > { %v1134_v19 = vsel %vm914_vm4, %v1129_v17, 0  ;;  %v1029_v20 = vsub.f32 %v1020_v8, %v1027_v18  ;;  %2680 = vpow2.f32 %v1030_v16 }
 0x4b7   : > { %2431 = vmatpush3.bf16.xpose.msra.mxu1 %v1134_v19 }
 0x4b8   : > { %v1032_v21 = vmul.f32 1.442695, %v1029_v20  ;;  %2442 = vmatprep.subr.bf16.mxu1 %v2912_v44 }
 0x4b9   : > { %v1122_v22 = vpop.permute.xlu0 %1121  ;;  %v1190_v27 = vpop.permute.xlu1 %1189 }
 0x4ba   : > { %2682 = vpow2.f32 %v1032_v21  ;;  %v1195_v29 = vsel %vm914_vm4, %v1190_v27, 0 }
 0x4bd   : > { %v1183_v30 = vpop.permute.xlu1 %1182 }
 0x4be   : > { %2433 = vmatmul.mubr.msk.bf16.vlgmr.msra.gmra.mxu1 %vm914_vm4, %v1122_v22 }
 0x4bf   : > { %2444 = vmatprep.mubr.msk.bf16.mxu1 %vm2913_vm2, %v2912_v44 }
 0x4c3   : > { %v3270_v23 = vpop.eup %2680 }
 0x4c7   : > { %v3272_v24 = vpop.eup %2682 }
 0x4c8   : > { %v1034_v28 = vpack.c.bf16 %v3272_v24, %v3270_v23 }
 0x4ca   : > { %2427 = vmatmul.mubr.msk.bf16.vlgmr.msra.gmra.mxu0 %vm1021_vm7, %v1034_v28 }
 0x4cb   : > { %2437 = vmatpush3.bf16.xpose.msra.mxu0 %v1195_v29  ;;  %2438 = vmatprep.mubr.msk.bf16.mxu0 %vm2913_vm2, %v2912_v44  ;;  %v2653_v29 = vld [vmem:[#allocation5] sm:$0xff]  }
 0x4cc   : > { %2448 = vmatprep.subr.bf16.mxu0 %v2912_v44 }
 0x4d2   : > { %2439 = vmatmul.mubr.msk.bf16.vlgmr.msra.gmra.mxu0 %vm914_vm4, %v1183_v30  ;;  %v2654_v30 = vld [vmem:[#allocation4] sm:$0xff]  }
 0x4d3   : > { %2450 = vmatprep.mubr.msk.bf16.mxu0 %vm2913_vm2, %v2912_v44 }
 0x57e   : > { %v1170_v31 = vpop.f32.mrf.mxu1 }
 0x580   : > { %v2434_v32 = vpop.f32.mrf.mxu1 }
 0x581   : > { %v2656_v32 = vld [vmem:[#allocation6] sm:$0xff]  }
 0x582   : > { %v1173_v33 = vpop.f32.mrf.mxu1 }
 0x584   : > { %v2435_v34 = vpop.f32.mrf.mxu1 }
 0x58a   : > { %v3284_v35 = vpop.f32.mrf.mxu0 }
 0x58c   : > { %v2428_v36 = vpop.f32.mrf.mxu0 }
 0x58e   : > { %v3286_v37 = vpop.f32.mrf.mxu0 }
 0x590   : > { %v2429_v38 = vpop.f32.mrf.mxu0 }
 0x592   : > { %v1231_v39 = vpop.f32.mrf.mxu0 }
 0x593   : > { %v1232_v40 = vadd.f32 %v1231_v39, %v1170_v31  ;;  %v2655_v31 = vld [vmem:[#allocation2] sm:$0xff]  }
 0x594   : > { %v2440_v41 = vpop.f32.mrf.mxu0 }
 0x595   : > { %v1238_v42 = vadd.f32 %v1232_v40, %v3257_v63 }
 0x596   : > { %v1234_v43 = vpop.f32.mrf.mxu0 }
 0x597   : > { %v1235_v45 = vadd.f32 %v1234_v43, %v1173_v33  ;;  %v1240_v46 = vsel %vm1021_vm7, %v1238_v42, -inf  ;;  %v2657_v33 = vld [vmem:[#allocation3] sm:$0xff]  }
 0x598   : > { %v2441_v48 = vpop.f32.mrf.mxu0  ;;  %1241 = vmax.xlane.f32.xlu0 %v1240_v46 }
 0x599   : > { %v1239_v49 = vadd.f32 %v1235_v45, %v3260_v4 }
 0x59b   : > { %v1243_v25 = vsel %vm1021_vm7, %v1239_v49, -inf }
 0x59c   : > { %1244 = vmax.xlane.f32.xlu1 %v1243_v25 }
 0x5ad   : > { %1352 = vrot.lane.b32.xlu1 %v2648_v47, %s2916_s17 }
 0x5ae   : > { %1260 = vrot.lane.b32.xlu0 %v2649_v50, %s2916_s17 }
 0x5b1   : > { %1345 = vrot.lane.b32.xlu1 %v2650_v52, %s2916_s17 }
 0x5b2   : > { %1413 = vrot.lane.b32.xlu0 %v2651_v53, %s2916_s17 }
 0x5b6   : > { %1406 = vrot.lane.b32.xlu0 %v2652_v26, %s2916_s17 }
 0x621   : > { %v1242_v51 = vpop.xlane.xlu0 %1241 }
 0x622   : > { %v1246_v54 = vsub.f32 %v1238_v42, %v1242_v51 }
 0x624   : > { %v1248_v55 = vmul.f32 1.442695, %v1246_v54 }
 0x625   : > { %v1261_v56 = vpop.permute.xlu0 %1260  ;;  %v1245_v57 = vpop.xlane.xlu1 %1244 }
 0x626   : > { %v1247_v58 = vsub.f32 %v1239_v49, %v1245_v57  ;;  %2443 = vmatpush3.bf16.msra.mxu1 %v1261_v56  ;;  %2684 = vpow2.f32 %v1248_v55 }
 0x627   : > { %2454 = vmatprep.subr.bf16.mxu1 %v2912_v44 }
 0x628   : > { %v1250_v59 = vmul.f32 1.442695, %v1247_v58 }
 0x629   : > { %v1353_v60 = vpop.permute.xlu1 %1352  ;;  %v1414_v2 = vpop.permute.xlu0 %1413 }
 0x62a   : > { %2686 = vpow2.f32 %v1250_v59  ;;  %v1358_v61 = vsel %vm914_vm4, %v1353_v60, 0  ;;  %v1419_v5 = vsel %vm914_vm4, %v1414_v2, 0 }
 0x62b   : > { %2449 = vmatpush3.bf16.xpose.msra.mxu0 %v1358_v61 }
 0x62c   : > { %2460 = vmatprep.subr.bf16.mxu0 %v2912_v44 }
 0x62d   : > { %v1346_v62 = vpop.permute.xlu1 %1345  ;;  %v1407_v6 = vpop.permute.xlu0 %1406 }
 0x632   : > { %2451 = vmatmul.mubr.msk.bf16.vlgmr.msra.gmra.mxu0 %vm914_vm4, %v1346_v62 }
 0x633   : > { %2462 = vmatprep.mubr.msk.bf16.mxu0 %vm2913_vm2, %v2912_v44  ;;  %v3298_v0 = vpop.eup %2684 }
 0x637   : > { %v3300_v1 = vpop.eup %2686 }
 0x638   : > { %v1252_v3 = vpack.c.bf16 %v3300_v1, %v3298_v0 }
 0x63a   : > { %2445 = vmatmul.mubr.msk.bf16.vlgmr.msra.gmra.mxu1 %vm1021_vm7, %v1252_v3 }
 0x63b   : > { %2455 = vmatpush3.bf16.xpose.msra.mxu1 %v1419_v5  ;;  %2456 = vmatprep.mubr.msk.bf16.mxu1 %vm2913_vm2, %v2912_v44 }
 0x63c   : > { %2466 = vmatprep.subr.bf16.mxu1 %v2912_v44 }
 0x642   : > { %2457 = vmatmul.mubr.msk.bf16.vlgmr.msra.gmra.mxu1 %vm914_vm4, %v1407_v6 }
 0x643   : > { %2468 = vmatprep.mubr.msk.bf16.mxu1 %vm2913_vm2, %v2912_v44 }
 0x6f2   : > { %v1394_v7 = vpop.f32.mrf.mxu0 }
 0x6f4   : > { %v2452_v8 = vpop.f32.mrf.mxu0 }
 0x6f6   : > { %v1397_v9 = vpop.f32.mrf.mxu0 }
 0x6f8   : > { %v2453_v10 = vpop.f32.mrf.mxu0 }
 0x6f9   : > { %v1310_v10 = vsel %vm1021_vm7, %v3300_v1, 0.0 }
 0x6fa   : > { %v3312_v11 = vpop.f32.mrf.mxu1 }
 0x6fc   : > { %v2446_v12 = vpop.f32.mrf.mxu1 }
 0x6fe   : > { %v3314_v13 = vpop.f32.mrf.mxu1 }
 0x700   : > { %v2447_v14 = vpop.f32.mrf.mxu1 }
 0x701   : > { %v2658_v14 = vld [vmem:[#allocation6] sm:$0xff]  }
 0x702   : > { %v1455_v15 = vpop.f32.mrf.mxu1 }
 0x703   : > { %v1456_v16 = vadd.f32 %v1455_v15, %v1394_v7 }
 0x704   : > { %v2458_v17 = vpop.f32.mrf.mxu1 }
 0x705   : > { %v1462_v18 = vadd.f32 %v1456_v16, %v3257_v63 }
 0x706   : > { %v1458_v19 = vpop.f32.mrf.mxu1 }
 0x707   : > { %v1459_v20 = vadd.f32 %v1458_v19, %v1397_v9  ;;  %v1464_v21 = vsel %vm1021_vm7, %v1462_v18, -inf  ;;  %v1307_v9 = vsel %vm1021_vm7, %v3298_v0, 0.0 }
 0x708   : > { %1465 = vmax.xlane.f32.xlu1 %v1464_v21  ;;  %v2459_v22 = vpop.f32.mrf.mxu1 }
 0x709   : > { %v1463_v27 = vadd.f32 %v1459_v20, %v3260_v4 }
 0x70b   : > { %v1467_v28 = vsel %vm1021_vm7, %v1463_v27, -inf }
 0x70c   : > { %1468 = vmax.xlane.f32.xlu0 %v1467_v28 }
 0x719   : > { %1576 = vrot.lane.b32.xlu1 %v2653_v29, %s2917_s20 }
 0x71d   : > { %1637 = vrot.lane.b32.xlu1 %v2654_v30, %s2917_s20 }
 0x721   : > { %1630 = vrot.lane.b32.xlu1 %v2655_v31, %s2917_s20  ;;  %v1087_v31 = vsel %vm1021_vm7, %v3270_v23, 0.0 }
 0x722   : > { %1484 = vrot.lane.b32.xlu0 %v2656_v32, %s2910_s0  ;;  %v1090_v32 = vsel %vm1021_vm7, %v3272_v24, 0.0  ;;  %s2920_s0 = smov 48  }
 0x726   : > { %1569 = vrot.lane.b32.xlu0 %v2657_v33, %s2917_s20 }
 0x791   : > { %v1466_v34 = vpop.xlane.xlu1 %1465 }
 0x792   : > { %v1470_v36 = vsub.f32 %v1462_v18, %v1466_v34 }
 0x794   : > { %v1472_v38 = vmul.f32 1.442695, %v1470_v36 }
 0x795   : > { %v1577_v39 = vpop.permute.xlu1 %1576  ;;  %v1469_v40 = vpop.xlane.xlu0 %1468 }
 0x796   : > { %v1582_v41 = vsel %vm914_vm4, %v1577_v39, 0  ;;  %v1471_v42 = vsub.f32 %v1463_v27, %v1469_v40  ;;  %2688 = vpow2.f32 %v1472_v38 }
 0x797   : > { %2467 = vmatpush3.bf16.xpose.msra.mxu1 %v1582_v41 }
 0x798   : > { %v1474_v43 = vmul.f32 1.442695, %v1471_v42  ;;  %2478 = vmatprep.subr.bf16.mxu1 %v2912_v44 }
 0x799   : > { %v1485_v45 = vpop.permute.xlu0 %1484  ;;  %v1638_v25 = vpop.permute.xlu1 %1637 }
 0x79a   : > { %2690 = vpow2.f32 %v1474_v43  ;;  %2461 = vmatpush3.bf16.msra.mxu0 %v1485_v45  ;;  %v1643_v50 = vsel %vm914_vm4, %v1638_v25, 0 }
 0x79b   : > { %2472 = vmatprep.subr.bf16.mxu0 %v2912_v44 }
 0x79d   : > { %v1570_v46 = vpop.permute.xlu0 %1569  ;;  %v1631_v52 = vpop.permute.xlu1 %1630 }
 0x79e   : > { %2469 = vmatmul.mubr.msk.bf16.vlgmr.msra.gmra.mxu1 %vm914_vm4, %v1570_v46 }
 0x79f   : > { %2480 = vmatprep.mubr.msk.bf16.mxu1 %vm2913_vm2, %v2912_v44 }
 0x7a3   : > { %v2689_v48 = vpop.eup %2688 }
 0x7a7   : > { %v2691_v49 = vpop.eup %2690 }
 0x7a8   : > { %v1476_v47 = vpack.c.bf16 %v2691_v49, %v2689_v48  ;;  %v1534_v12 = vsel %vm1021_vm7, %v2691_v49, 0.0 }
 0x7aa   : > { %2463 = vmatmul.mubr.msk.bf16.vlgmr.msra.gmra.mxu0 %vm1021_vm7, %v1476_v47 }
 0x7ab   : > { %2473 = vmatpush3.bf16.xpose.msra.mxu0 %v1643_v50  ;;  %2474 = vmatprep.mubr.msk.bf16.mxu0 %vm2913_vm2, %v2912_v44 }
 0x7ac   : > { %2484 = vmatprep.subr.bf16.mxu0 %v2912_v44 }
 0x7b2   : > { %2475 = vmatmul.mubr.msk.bf16.vlgmr.msra.gmra.mxu0 %vm914_vm4, %v1631_v52 }
 0x7b3   : > { %2492 = vmatprep.mubr.msk.bf16.mxu0 %vm2913_vm2, %v2912_v44 }
 0x85e   : > { %v1618_v53 = vpop.f32.mrf.mxu1 }
 0x860   : > { %v2470_v26 = vpop.f32.mrf.mxu1 }
 0x862   : > { %v1621_v51 = vpop.f32.mrf.mxu1 }
 0x864   : > { %v2471_v54 = vpop.f32.mrf.mxu1 }
 0x86a   : > { %v3335_v55 = vpop.f32.mrf.mxu0 }
 0x86c   : > { %v2464_v56 = vpop.f32.mrf.mxu0 }
 0x86e   : > { %v3337_v57 = vpop.f32.mrf.mxu0 }
 0x870   : > { %v2465_v58 = vpop.f32.mrf.mxu0 }
 0x871   : > { %v2661_v58 = vld [vmem:[#allocation13 + $0x8] sm:$0xff]  }
 0x872   : > { %v1679_v59 = vpop.f32.mrf.mxu0 }
 0x873   : > { %v1680_v60 = vadd.f32 %v1679_v59, %v1618_v53  ;;  %v2662_v59 = vld [vmem:[#allocation13] sm:$0xff]  }
 0x874   : > { %v2476_v61 = vpop.f32.mrf.mxu0 }
 0x875   : > { %v1686_v62 = vadd.f32 %v1680_v60, %v3257_v63  ;;  %v1531_v63 = vsel %vm1021_vm7, %v2689_v48, 0.0 }
 0x876   : > { %v1682_v2 = vpop.f32.mrf.mxu0 }
 0x877   : > { %v1683_v3 = vadd.f32 %v1682_v2, %v1621_v51  ;;  %v1688_v5 = vsel %vm1021_vm7, %v1686_v62, -inf }
 0x878   : > { %v2477_v6 = vpop.f32.mrf.mxu0  ;;  %1689 = vmax.xlane.f32.xlu0 %v1688_v5 }
 0x879   : > { %v1687_v7 = vadd.f32 %v1683_v3, %v3260_v4 }
 0x87b   : > { %v1691_v8 = vsel %vm1021_vm7, %v1687_v7, -inf }
 0x87c   : > { %1692 = vmax.xlane.f32.xlu1 %v1691_v8 }
 0x880   : > { %1308 = vadd.xlane.f32.xlu1 %v1307_v9 }
 0x884   : > { %1311 = vadd.xlane.f32.xlu1 %v1310_v10 }
 0x888   : > { %1532 = vadd.xlane.f32.xlu1 %v1531_v63 }
 0x88c   : > { %1535 = vadd.xlane.f32.xlu1 %v1534_v12  ;;  %v2320_v12 = vld [vmem:[%s3496_s5] ss:$0 sm:$0xff] }
 0x88e   : > { %1708 = vrot.lane.b32.xlu0 %v2658_v14, %s2918_s28  ;;  %s3445_s28 = scalar_lea.hbm %s3507_s16, %s2368_s18 }
 0x901   : > { %v1690_v4 = vpop.xlane.xlu0 %1689 }
 0x902   : > { %v1694_v15 = vsub.f32 %v1686_v62, %v1690_v4 }
 0x904   : > { %v1696_v16 = vmul.f32 1.442695, %v1694_v15 }
 0x905   : > { %v1709_v17 = vpop.permute.xlu0 %1708  ;;  %v1693_v18 = vpop.xlane.xlu1 %1692 }
 0x906   : > { %2692 = vpow2.f32 %v1696_v16  ;;  %v1695_v0 = vsub.f32 %v1687_v7, %v1693_v18  ;;  %2479 = vmatpush3.bf16.msra.mxu1 %v1709_v17  ;;  %v2720_v16 = vld [vmem:[%s3123_s30] sm:$0xff] }
 0x907   : > { %2496 = vmatprep.subr.bf16.mxu1 %v2912_v44 }
 0x908   : > { %v1698_v1 = vmul.f32 1.442695, %v1695_v0 }
 0x909   : > { %v1309_v19 = vpop.xlane.xlu1 %1308 }
 0x90a   : > { %2694 = vpow2.f32 %v1698_v1 }
 0x90d   : > { %v1312_v20 = vpop.xlane.xlu1 %1311 }
 0x90e   : > { %2696 = vrcp.f32 %v1312_v20  ;;  %v2721_v20 = vld [vmem:[%s3123_s30 + $0x8] sm:$0xff] }
 0x90f   : > { %2698 = vrcp.f32 %v1309_v19 }
 0x911   : > { %v1533_v30 = vpop.xlane.xlu1 %1532 }
 0x912   : > { %2700 = vrcp.f32 %v1533_v30 }
 0x913   : > { %v2693_v21 = vpop.eup %2692 }
 0x914   : > { %v1755_v22 = vsel %vm1021_vm7, %v2693_v21, 0.0 }
 0x915   : > { %1756 = vadd.xlane.f32.xlu0 %v1755_v22  ;;  %v1536_v33 = vpop.xlane.xlu1 %1535 }
 0x916   : > { %2702 = vrcp.f32 %v1536_v33 }
 0x917   : > { %v2695_v27 = vpop.eup %2694 }
 0x918   : > { %v1758_v28 = vsel %vm1021_vm7, %v2695_v27, 0.0  ;;  %v1700_v29 = vpack.c.bf16 %v2695_v27, %v2693_v21 }
 0x919   : > { %1759 = vadd.xlane.f32.xlu1 %v1758_v28 }
 0x91a   : > { %2481 = vmatmul.mubr.msk.bf16.vlgmr.msra.gmra.mxu1 %vm1021_vm7, %v1700_v29 }
 0x91b   : > { %2504 = vmatprep.mubr.msk.bf16.mxu1 %vm2913_vm2, %v2912_v44  ;;  %v2697_v34 = vpop.eup %2696 }
 0x91c   : > { %v1316_v36 = vmul.f32 %v2697_v34, %v3314_v13  ;;  %v2699_v38 = vpop.eup %2698  ;;  %v2659_v13 = vld [vmem:[#allocation13 + $0x18] sm:$0xff]  }
 0x91d   : > { %1088 = vadd.xlane.f32.xlu1 %v1087_v31  ;;  %v1315_v40 = vmul.f32 %v2699_v38, %v3312_v11  ;;  %2485 = vmatpush3.bf16.msra.mxu0 %v2659_v13 }
 0x91e   : > { %v2363_v39 = vpack.c.bf16 %v1316_v36, %v1316_v36  ;;  %2486 = vmatprep.subr.bf16.mxu0 %v2912_v44 }
 0x91f   : > { %v2701_v41 = vpop.eup %2700  ;;  %v2362_v42 = vpack.c.bf16 %v1315_v40, %v1315_v40  ;;  %v2665_v40 = vld [vmem:[#allocation14 + $0x10] sm:$0xff]  }
 0x920   : > { %v1539_v23 = vmul.f32 %v2701_v41, %v3335_v55  ;;  %v2666_v41 = vld [vmem:[#allocation14 + $0x8] sm:$0xff]  }
 0x921   : > { %1091 = vadd.xlane.f32.xlu1 %v1090_v32 }
 0x922   : > { %v2364_v45 = vpack.c.bf16 %v1539_v23, %v1539_v23  ;;  %v2668_v23 = vld [vmem:[%s3499_s8 + $0x38] sm:$0xff]  }
 0x923   : > { %v2703_v43 = vpop.eup %2702 }
 0x924   : > { %v1540_v24 = vmul.f32 %v2703_v43, %v3337_v57 }
 0x926   : > { %v2365_v46 = vpack.c.bf16 %v1540_v24, %v1540_v24 }
 0x92b   : > { %1325 = vrot.lane.b32.xlu0 %v2363_v39, %s2919_s23  ;;  %v2664_v39 = vld [vmem:[#allocation14 + $0x18] sm:$0xff]  }
 0x92c   : > { %2497 = vmatpush3.bf16.msra.mxu1 %v2664_v39 }
 0x92d   : > { %2498 = vmatprep.subr.bf16.mxu1 %v2912_v44 }
 0x930   : > { %2499 = vmatpush3.bf16.msra.mxu1 %v2665_v40 }
 0x931   : > { %2500 = vmatprep.subr.bf16.mxu1 %v2912_v44 }
 0x932   : > { %1323 = vrot.lane.b32.xlu1 %v2362_v42, %s2919_s23  ;;  %v2667_v42 = vld [vmem:[#allocation14] sm:$0xff]  }
 0x934   : > { %2501 = vmatpush3.bf16.msra.mxu1 %v2666_v41 }
 0x935   : > { %2502 = vmatprep.subr.bf16.mxu1 %v2912_v44 }
 0x936   : > { %1547 = vrot.lane.b32.xlu1 %v2364_v45, %s2911_s19 }
 0x938   : > { %2503 = vmatpush3.bf16.msra.mxu1 %v2667_v42 }
 0x93a   : > { %1549 = vrot.lane.b32.xlu1 %v2365_v46, %s2911_s19  ;;  %s571_s19 = sand.u32 1, %s2890_s22  }
 0x93b   : > { %s2256_s25 = sshll.u32 %s571_s19, 4  ;;  %s3451_s14 = scalar_lea.sflag [#allocation10], %s571_s19 }
 0x93c   : > { %s573_s26 = scalar_lea.vmem [#allocation16], %s2256_s25 }
 0x93d   : > { %s2141_s15 = sshll.u32 %s573_s26, 4  ;;  %s3447_s15 = int_to_ptr.vmem [resolvable:$true] %s2141_s15 }
 0x93e   : > { %s2826_s23 = scalar_lea.vmem %s3447_s15, 256 }
 0x93f   : > { %p2827_p9 = scmp.ne.s32.totalorder %s3447_s15, %s2826_s23 }
 0x941   : > { %p2828_p3 = pnand %p2827_p9, %p3530_p1 }
 0x943   : > { %p2829_p5 = pneg %p2828_p3 }
 0x99e   : > { %v1757_v52 = vpop.xlane.xlu0 %1756 }
 0x9a2   : > { %v1760_v48 = vpop.xlane.xlu1 %1759  ;;  %v1326_v56 = vpop.permute.xlu0 %1325 }
 0x9a6   : > { %v1089_v11 = vpop.xlane.xlu1 %1088 }
 0x9a7   : > { %2704 = vrcp.f32 %v1089_v11 }
 0x9aa   : > { %v1092_v49 = vpop.xlane.xlu1 %1091 }
 0x9ab   : > { %2706 = vrcp.f32 %v1092_v49 }
 0x9ac   : > { %2708 = vrcp.f32 %v1757_v52 }
 0x9ad   : > { %2710 = vrcp.f32 %v1760_v48 }
 0x9ae   : > { %v1324_v25 = vpop.permute.xlu1 %1323 }
 0x9b2   : > { %v1548_v51 = vpop.permute.xlu1 %1547 }
 0x9b4   : > { %v2705_v47 = vpop.eup %2704 }
 0x9b5   : > { %v1095_v50 = vmul.f32 %v2705_v47, %v3284_v35  ;;  %v2660_v35 = vld [vmem:[#allocation13 + $0x10] sm:$0xff]  }
 0x9b6   : > { %v1550_v57 = vpop.permute.xlu1 %1549  ;;  %2487 = vmatpush3.bf16.msra.mxu0 %v2660_v35  ;;  %v2671_v35 = vld [vmem:[%s3499_s8 + $0x20] sm:$0xff]  }
 0x9b7   : > { %v2360_v53 = vpack.c.bf16 %v1095_v50, %v1095_v50  ;;  %2488 = vmatprep.subr.bf16.mxu0 %v2912_v44 }
 0x9b8   : > { %v2707_v26 = vpop.eup %2706 }
 0x9b9   : > { %v1096_v54 = vmul.f32 %v2707_v26, %v3286_v37  ;;  %1106 = vst.msk [vmem:[#allocation7] sm:$0xf] %vm1105_vm8, %v2360_v53  ;;  %v2709_v37 = vpop.eup %2708  ;;  %v2328_v53 = vld [vmem:[%s3504_s13] ss:$0 sm:$0xff] }
 0x9ba   : > { %1330 = vst.msk [vmem:[#allocation7] sm:$0xf] %vm1329_vm9, %v1324_v25  ;;  %2489 = vmatpush3.bf16.msra.mxu0 %v2661_v58  ;;  %v2711_v3 = vpop.eup %2710  ;;  %v2327_v25 = vld [vmem:[%s3503_s12] ss:$0 sm:$0xff]  ;;  %v2672_v58 = vld [vmem:[%s3499_s8 + $0x18] sm:$0xff]  }
 0x9bb   : > { %v2361_v55 = vpack.c.bf16 %v1096_v54, %v1096_v54  ;;  %1554 = vst.msk [vmem:[#allocation7] sm:$0xf] %vm1553_vm10, %v1548_v51  ;;  %2490 = vmatprep.subr.bf16.mxu0 %v2912_v44 }
 0x9bd   : > { %1107 = vst.msk [vmem:[#allocation7 + $0x4] sm:$0xf] %vm1105_vm8, %v2361_v55 }
 0x9be   : > { %1331 = vst.msk [vmem:[#allocation7 + $0x4] sm:$0xf] %vm1329_vm9, %v1326_v56  ;;  %2491 = vmatpush3.bf16.msra.mxu0 %v2662_v59  ;;  %v2669_v56 = vld [vmem:[%s3499_s8 + $0x30] sm:$0xff]  }
 0x9bf   : > { %1555 = vst.msk [vmem:[#allocation7 + $0x4] sm:$0xf] %vm1553_vm10, %v1550_v57  ;;  %2508 = vmatprep.subr.bf16.mxu0 %v2912_v44  ;;  %v2670_v57 = vld [vmem:[%s3499_s8 + $0x28] sm:$0xff]   ;;  %v2673_v59 = vld [vmem:[%s3499_s8 + $0x10] sm:$0xff]  }
 0x9da   : > { %v1748_v60 = vpop.f32.mrf.mxu1 }
 0x9db   : > { %v1763_v61 = vmul.f32 %v2709_v37, %v1748_v60  ;;  %v2674_v37 = vld [vmem:[%s3499_s8 + $0x8] sm:$0xff]   ;;  %v2675_v60 = vld [vmem:[%s3499_s8] sm:$0xff]  }
 0x9dc   : > { %v2482_v62 = vpop.f32.mrf.mxu1 }
 0x9dd   : > { %v2366_v2 = vpack.c.bf16 %v1763_v61, %v1763_v61  ;;  %v2329_v61 = vld [vmem:[%s3498_s7] ss:$0 sm:$0xff] }
 0x9de   : > { %v1751_v5 = vpop.f32.mrf.mxu1 }
 0x9df   : > { %v1764_v6 = vmul.f32 %v2711_v3, %v1751_v5  ;;  %1771 = vrot.lane.b32.xlu1 %v2366_v2, %s2920_s0 }
 0x9e0   : > { %v2483_v7 = vpop.f32.mrf.mxu1 }
 0x9e1   : > { %v2367_v8 = vpack.c.bf16 %v1764_v6, %v1764_v6 }
 0x9e3   : > { %1773 = vrot.lane.b32.xlu1 %v2367_v8, %s2920_s0  ;;  %s2921_s0 = smov [#allocation16]  }
 0x9e4   : > { %s2830_s27 = sshll.u32 %s2921_s0, 4  ;;  %s2831_s27 = int_to_ptr.vmem [resolvable:$false] %s2830_s27 }
 0x9e5   : > { %s2832_s30 = scalar_lea.vmem %s2831_s27, 512  ;;  %p2833_p2 = scmp.lt.s32.totalorder %s3447_s15, %s2831_s27 }
 0x9e6   : > { %p2834_p4 = scmp.lt.s32.totalorder %s2832_s30, %s2826_s23 }
 0x9e8   : > { %p2835_p7 = por %p2834_p4, %p2833_p2 }
 0x9ea   : > { %p2836_p8 = pnand %p2835_p7, %p2829_p5 }
 0xa51   : > { %v1772_v9 = vpop.permute.xlu1 %1771 }
 0xa52   : > { %1778 = vst.msk [vmem:[#allocation7] sm:$0xf] %vm1777_vm11, %v1772_v9 }
 0xa55   : > { %v1774_v10 = vpop.permute.xlu1 %1773 }
 0xa56   : > { %1779 = vst.msk [vmem:[#allocation7 + $0x4] sm:$0xf] %vm1777_vm11, %v1774_v10 }
 0xa5d   : > { %v2663_v63 = vld [vmem:[#allocation7] sm:$0xff]  }
 0xa5e   : > { %2493 = vmatmul.mubr.msk.bf16.vlgmr.msra.gmra.mxu0 %vm588_vm0, %v2663_v63 }
 0xa5f   : > { %2524 = vmatprep.mubr.msk.bf16.mxu0 %vm2913_vm2, %v2912_v44  ;;  %2509 = vmatpush3.bf16.msra.mxu0 %v2668_v23 }
 0xa60   : > { %2510 = vmatprep.subr.bf16.mxu0 %v2912_v44 }
 0xa63   : > { %2511 = vmatpush3.bf16.msra.mxu0 %v2669_v56 }
 0xa64   : > { %2512 = vmatprep.subr.bf16.mxu0 %v2912_v44 }
 0xa67   : > { %2513 = vmatpush3.bf16.msra.mxu0 %v2670_v57 }
 0xa68   : > { %2514 = vmatprep.subr.bf16.mxu0 %v2912_v44 }
 0xa6b   : > { %2515 = vmatpush3.bf16.msra.mxu0 %v2671_v35 }
 0xa6c   : > { %2516 = vmatprep.subr.bf16.mxu0 %v2912_v44 }
 0xa6f   : > { %2517 = vmatpush3.bf16.msra.mxu0 %v2672_v58 }
 0xa70   : > { %2518 = vmatprep.subr.bf16.mxu0 %v2912_v44 }
 0xa73   : > { %2519 = vmatpush3.bf16.msra.mxu0 %v2673_v59 }
 0xa74   : > { %2520 = vmatprep.subr.bf16.mxu0 %v2912_v44 }
 0xa77   : > { %2521 = vmatpush3.bf16.msra.mxu0 %v2674_v37 }
 0xa78   : > { %2522 = vmatprep.subr.bf16.mxu0 %v2912_v44 }
 0xa7b   : > { %2523 = vmatpush3.bf16.msra.mxu0 %v2675_v60 }
 0xb1e   : > { %v1863_v14 = vpop.f32.mrf.mxu0 }
 0xb1f   : > { %v1864_v4 = vadd.f32 %v2320_v12, %v1863_v14 }
 0xb20   : > { %v2494_v15 = vpop.f32.mrf.mxu0 }
 0xb21   : > { %v3378_v17 = vadd.f32 %v2720_v16, %v1864_v4 }
 0xb22   : > { %v1866_v18 = vpop.f32.mrf.mxu0 }
 0xb23   : > { %v1867_v0 = vadd.f32 %v2320_v12, %v1866_v18  ;;  %v1874_v1 = vsel %vm588_vm0, %v3378_v17, 0.0 }
 0xb24   : > { %1875 = vadd.xlane.f32.xlu1 %v1874_v1  ;;  %v2495_v19 = vpop.f32.mrf.mxu0 }
 0xb25   : > { %v3383_v21 = vadd.f32 %v2721_v20, %v1867_v0  ;;  %v2335_v0 = vld [vmem:[%s3500_s9] ss:$0 sm:$0xff] }
 0xb27   : > { %v1877_v22 = vsel %vm588_vm0, %v3383_v21, 0.0 }
 0xb28   : > { %1878 = vadd.xlane.f32.xlu0 %v1877_v22 }
 0xbad   : > { %v1876_v27 = vpop.xlane.xlu1 %1875 }
 0xbae   : > { %v1880_v28 = vmul.f32 0.015625, %v1876_v27 }
 0xbb0   : > { %v1882_v29 = vsub.f32 %v3378_v17, %v1880_v28 }
 0xbb1   : > { %v1879_v30 = vpop.xlane.xlu0 %1878 }
 0xbb2   : > { %v1881_v31 = vmul.f32 0.015625, %v1879_v30  ;;  %v1884_v32 = vmul.f32 %v1882_v29, %v1882_v29 }
 0xbb4   : > { %v1883_v33 = vsub.f32 %v3383_v21, %v1881_v31  ;;  %v1886_v34 = vsel %vm588_vm0, %v1884_v32, 0.0 }
 0xbb5   : > { %1887 = vadd.xlane.f32.xlu1 %v1886_v34 }
 0xbb6   : > { %v1885_v36 = vmul.f32 %v1883_v33, %v1883_v33 }
 0xbb8   : > { %v1889_v38 = vsel %vm588_vm0, %v1885_v36, 0.0 }
 0xbb9   : > { %1890 = vadd.xlane.f32.xlu0 %v1889_v38 }
 0xc3e   : > { %v1888_v43 = vpop.xlane.xlu1 %1887 }
 0xc3f   : > { %v1892_v45 = vmul.f32 0.015625, %v1888_v43 }
 0xc41   : > { %v1894_v24 = vadd.f32 1e-05, %v1892_v45 }
 0xc42   : > { %v1891_v46 = vpop.xlane.xlu0 %1890 }
 0xc43   : > { %2712 = vrsqrt.f32 %v1894_v24  ;;  %v1893_v13 = vmul.f32 0.015625, %v1891_v46 }
 0xc45   : > { %v1895_v48 = vadd.f32 1e-05, %v1893_v13 }
 0xc47   : > { %2714 = vrsqrt.f32 %v1895_v48 }
 0xc50   : > { %v2713_v11 = vpop.eup %2712 }
 0xc51   : > { %v1898_v49 = vmul.f32 %v2713_v11, %v1882_v29 }
 0xc53   : > { %v1906_v52 = vmul.f32 %v2327_v25, %v1898_v49 }
 0xc54   : > { %v2715_v47 = vpop.eup %2714 }
 0xc55   : > { %v1899_v50 = vmul.f32 %v2715_v47, %v1883_v33  ;;  %v1914_v51 = vadd.f32 %v2328_v53, %v1906_v52 }
 0xc57   : > { %v1907_v26 = vmul.f32 %v2327_v25, %v1899_v50 }
 0xc59   : > { %v1915_v54 = vadd.f32 %v2328_v53, %v1907_v26 }
 0xc5b   : > { %v1916_v55 = vpack.c.bf16 %v1915_v54, %v1914_v51 }
 0xc5d   : > { %2505 = vmatmul.mubr.msk.bf16.vlgmr.msra.gmra.mxu1 %vm588_vm0, %v1916_v55 }
 0xd1d   : > { %v1993_v62 = vpop.f32.mrf.mxu1 }
 0xd1e   : > { %v1994_v2 = vadd.f32 %v2329_v61, %v1993_v62 }
 0xd1f   : > { %v2506_v3 = vpop.f32.mrf.mxu1 }
 0xd20   : > { %v2002_v5 = vmul.f32 0.70710677, %v1994_v2  ;;  %v2000_v12 = vmul.f32 0.5, %v1994_v2 }
 0xd21   : > { %v1996_v6 = vpop.f32.mrf.mxu1 }
 0xd22   : > { %2716 = verf.f32 %v2002_v5  ;;  %v1997_v7 = vadd.f32 %v2329_v61, %v1996_v6 }
 0xd23   : > { %v2507_v8 = vpop.f32.mrf.mxu1 }
 0xd24   : > { %v2003_v9 = vmul.f32 0.70710677, %v1997_v7  ;;  %v2001_v14 = vmul.f32 0.5, %v1997_v7 }
 0xd26   : > { %2718 = verf.f32 %v2003_v9 }
 0xd2f   : > { %v2717_v44 = vpop.eup %2716 }
 0xd30   : > { %v2006_v10 = vadd.f32 1.0, %v2717_v44 }
 0xd32   : > { %v2008_v15 = vmul.f32 %v2006_v10, %v2000_v12 }
 0xd33   : > { %v2719_v63 = vpop.eup %2718 }
 0xd34   : > { %v2007_v4 = vadd.f32 1.0, %v2719_v63 }
 0xd36   : > { %v2009_v16 = vmul.f32 %v2007_v4, %v2001_v14 }
 0xd38   : > { %v2010_v18 = vpack.c.bf16 %v2009_v16, %v2008_v15 }
 0xd3a   : > { %2525 = vmatmul.mubr.bf16.vlgmr.msra.gmra.mxu0 %v2010_v18 }
 0xdfa   : > { %v2116_v1 = vpop.f32.mrf.mxu0 }
 0xdfb   : > { %v2117_v19 = vadd.f32 %v2335_v0, %v2116_v1 }
 0xdfc   : > { %v2526_v20 = vpop.f32.mrf.mxu0 }
 0xdfd   : > { %v2123_v22 = vadd.f32 %v2117_v19, %v3378_v17 }
 0xdfe   : > { %v2119_v27 = vpop.f32.mrf.mxu0 }
 0xdff   : > { %2125 = vst.msk [vmem:[%s573_s26] sm:$0xff] %vm588_vm0, %v2123_v22  ;;  %v2120_v28 = vadd.f32 %v2335_v0, %v2119_v27 }
 0xe00   : > { %v2527_v29 = vpop.f32.mrf.mxu0 }
 0xe01   : > { %v2124_v17 = vadd.f32 %v2120_v28, %v3383_v21 }
 0xe03   : > { %2126 = vst.msk [vmem:[%s573_s26 + $0x8] sm:$0xff] %vm588_vm0, %v2124_v17 }
 0xe04   : > { %2839 = shalt.err (!%p2836_p8)
}
 0xe05   : > { %s2840_s19 = scalar_lea.hbm %s3445_s28, 256  ;;  %s2844_s26 = scalar_lea.hbm %s3507_s16, 512 }
 0xe06   : > { %p2841_p13 = scmp.ne.s32.totalorder %s3445_s28, %s2840_s19  ;;  %p2845_p6 = scmp.lt.s32.totalorder %s3445_s28, %s3507_s16 }
 0xe07   : > { %p2846_p12 = scmp.lt.s32.totalorder %s2844_s26, %s2840_s19 }
 0xe08   : > { %p2842_p11 = pnand %p2841_p13, %p3530_p1 }
 0xe09   : > { %p2847_p10 = por %p2846_p12, %p2845_p6 }
 0xe0a   : > { %p2843_p0 = pneg %p2842_p11 }
 0xe0c   : > { %p2848_p9 = pnand %p2847_p10, %p2843_p0 }
 0xe0e   : > { %2851 = shalt.err (!%p2848_p9)
}
 0xe0f   : > { %s2922_s23 = smov 128   ;;  %s2923_s0 = smov 8  }
 0xe10   : > { %2544 = dma.vmem_to_hbm [thread:$0]  (%p3530_p1), %s3447_s15, 256, %s3445_s28, %s3451_s14, %s2922_s23, %s2922_s23, %s2923_s0  }
 0xe11 PF: > { %s3531_s27 = sld [smem:[#allocation24_spill]]  ;;  %p2571_p3 = scmp.ge.s32.totalorder %s2898_s24, 2 }
 0xe12   : > { %s2156_s30 = sand.u32 1, %s2886_s21  }
 0xe13   : > { %s2157_s19 = scalar_lea.sflag [#allocation10], %s2156_s30 }
 0xe17   : > { %p3532_p5 = scmp.ne.s32.totalorder %s3531_s27, 0 }
 0xe19   : > { %p2560_p2 = pnand %p2571_p3, %p3532_p5 }
 0xe1b   : > { %p2561_p4 = pneg %p2560_p2 }
 0xe1d   : > { %2881 = dma.done.wait (%p2561_p4), %s2157_s19, 256  }
 0xe1e   : > { %2883 = vsyncadd (%p2561_p4), %s2157_s19, 4294967040  ;;  %s3533_s24 = sld [smem:[#allocation22_spill]]  ;;  %s3536_s21 = smov %s2890_s22 }
 0xe1f   : > { %s3534_s25 = sld [smem:[#allocation21_spill]] }
 0xe20   : > { %s3535_s23 = sld [smem:[#allocation23_spill]] }
 0xe24   : > { %p29_p7 = scmp.ge.s32.totalorder %s3533_s24, 4  }
 0xe25   : > { %s3537_s22 = smov %s3534_s25 }
 0xe26   :  { %31 = sbr.rel (!%p29_p7) target bundleno = 8 (0x8), region = 136 }
 0xe2b   :  { %2162 = vsyncpa [#allocation9], 1 }
 0xe2c   :  { %2164 = vsyncpa [#allocation9 + $0x1], 1 }
 0xe2d   :  { %2165 = vsyncpa [#allocation12], 1 }
 0xe2e   :  { %2166 = vsyncpa [#allocation15], 1 }
 0xe2f   :  { %2167 = vsyncpa [#allocation10], 1 }
 0xe30   :  { %2169 = vsyncpa [#allocation10 + $0x1], 1 }

</bundles_post_ra>
